<compile_context>
chip_gen: v7x
topology: tpu7x:2x2x1
jax: 0.10.0
libtpu: 0.0.40
codegen_flags: <defaults>
</compile_context>

<pallas_src>
import jax
import jax.numpy as jnp
from jax.experimental import pallas as pl
from jax.experimental.pallas import tpu as pltpu

_PAD_N = 256                 # 220 -> 256 (lane-dense, full MXU columns)
_MAX_TILE_B = 2048           # batch rows per grid step (multiple of 128)
_VMEM_LIMIT = 48 * 1024 * 1024  # > v5e's 16 MiB default, < v7x's 64 MiB physical


def _round_up(n, m):
    return ((n + m - 1) // m) * m


def _cdiv(a, b):
    return -(-a // b)


def _device_kind():
    try:
        return jax.devices()[0].device_kind.lower()
    except Exception:  # pragma: no cover - defensive
        return ""


def _is_v7x(kind=None):
    kind = _device_kind() if kind is None else kind
    return ("v7" in kind) or ("tpu7" in kind) or ("7x" in kind)


def _has_bf16_vpu(kind=None):
    """bf16 elementwise epilogue is only a win where the VPU supports bf16."""
    kind = _device_kind() if kind is None else kind
    for old in ("v2", "v3", "v4", "v5"):
        if old in kind:
            return False
    return True


def _leaky_relu(x, slope=0.01):
    # max(x, a*x) == where(x > 0, x, a*x) for 0 < a < 1; one fewer VALU op.
    return jnp.maximum(x, x * slope)


def discriminator_kernel(x_ref,
                         w1_ref, b1_ref,
                         w2_ref, b2_ref,
                         w3_ref, b3_ref,
                         w4_ref, b4_ref,
                         w5_ref, b5_ref,
                         w6_ref, b6_ref,
                         o_ref):
    x = x_ref[...]                 # (TB, 4) f32
    w1 = w1_ref[...]               # (4, 32) f32
    mm_dtype = w2_ref.dtype        # bf16 (default) or f32 (bit-check path)
    act_dtype = b2_ref.dtype       # bf16 epilogue on v6e/v7x, f32 otherwise

    # conv1 (L=1, 'same' -> center tap only).  K=4 is too shallow for the MXU;
    # do it as 4 VPU fused multiply-accumulates.
    # TODO(synk): on v6e/v7x this could be routed through the MXU as a
    # (TB,8)x(8,32) matmul if a bundle dump shows the VPU slot binding.
    h = b1_ref[...] + x[:, 0:1] * w1[0:1, :]
    h = h + x[:, 1:2] * w1[1:2, :]
    h = h + x[:, 2:3] * w1[2:3, :]
    h = h + x[:, 3:4] * w1[3:4, :]
    h = _leaky_relu(h)                                             # (TB, 32)

    # conv2 / conv3 (center-tap matmuls) on the MXU, f32 accumulation; the
    # bias + activation epilogue runs in act_dtype (bf16 on v6e/v7x).
    h = jnp.dot(h.astype(mm_dtype), w2_ref[...],
                preferred_element_type=jnp.float32).astype(act_dtype)
    h = _leaky_relu(h + b2_ref[...])                               # (TB, 64)
    h = jnp.dot(h.astype(mm_dtype), w3_ref[...],
                preferred_element_type=jnp.float32).astype(act_dtype)
    h = _leaky_relu(h + b3_ref[...])                               # (TB, 128)

    # linear1 / linear2: 220 zero-padded to 256 (exact zeros).
    h = jnp.dot(h.astype(mm_dtype), w4_ref[...],
                preferred_element_type=jnp.float32).astype(act_dtype)
    h = _leaky_relu(h + b4_ref[...])                               # (TB, 256)
    h = jnp.dot(h.astype(mm_dtype), w5_ref[...],
                preferred_element_type=jnp.float32).astype(act_dtype)
    h = jnp.maximum(h + b5_ref[...], 0.0)                          # (TB, 256)

    # linear3 (N=1): broadcast-multiply + lane reduction (VPU/XLU), then
    # relayout the (TB, 1) logit into a dense (TB//128, 128) slab so the
    # sigmoid (EUP) and the output store work on dense, lane-major vregs.
    p = h.astype(jnp.float32) * w6_ref[...]                        # (TB, 256)
    logit = jnp.sum(p, axis=-1, keepdims=True)                     # (TB, 1)
    g = o_ref.shape[1]                                             # TB // 128
    logit = logit.reshape(g, 128) + b6_ref[...]                    # (G, 128)

    # Numerically stable sigmoid (no inf intermediate for large |logit|).
    e = jnp.exp(-jnp.abs(logit))
    sig = jnp.where(logit >= 0, 1.0, e) / (1.0 + e)
    o_ref[0] = sig.astype(o_ref.dtype)


def init_params(key):
    """Deterministic parameter init matching the PyTorch module's shapes."""
    def uniform(k, shape, bound):
        return jax.random.uniform(k, shape, jnp.float32, -bound, bound)

    ks = jax.random.split(key, 12)
    params = {}
    # Conv1d weights: (out_ch, in_ch, kernel=3), biases (out_ch,)
    params["conv1_w"] = uniform(ks[0], (32, 4, 3),   (1.0 / (4 * 3)) ** 0.5)
    params["conv1_b"] = uniform(ks[1], (32,),        (1.0 / (4 * 3)) ** 0.5)
    params["conv2_w"] = uniform(ks[2], (64, 32, 3),  (1.0 / (32 * 3)) ** 0.5)
    params["conv2_b"] = uniform(ks[3], (64,),        (1.0 / (32 * 3)) ** 0.5)
    params["conv3_w"] = uniform(ks[4], (128, 64, 3), (1.0 / (64 * 3)) ** 0.5)
    params["conv3_b"] = uniform(ks[5], (128,),       (1.0 / (64 * 3)) ** 0.5)
    # Linear weights: (out_features, in_features), biases (out_features,)
    params["lin1_w"] = uniform(ks[6], (220, 128), (1.0 / 128) ** 0.5)
    params["lin1_b"] = uniform(ks[7], (220,),     (1.0 / 128) ** 0.5)
    params["lin2_w"] = uniform(ks[8], (220, 220), (1.0 / 220) ** 0.5)
    params["lin2_b"] = uniform(ks[9], (220,),     (1.0 / 220) ** 0.5)
    params["lin3_w"] = uniform(ks[10], (1, 220),  (1.0 / 220) ** 0.5)
    params["lin3_b"] = uniform(ks[11], (1,),      (1.0 / 220) ** 0.5)
    return params


def pack_params(params, use_bf16=True, bf16_epilogue=False):
    """One-time packing: center-tap slice, transpose, zero-pad 220->256, cast.

    MXU-bound weights (conv2/conv3/linear1/linear2) are cast to the matmul
    dtype (bf16 by default).  If `bf16_epilogue` is set (v6e/v7x), the biases
    b2..b5 are packed in bf16 so the elementwise epilogue also runs in bf16.
    conv1, the linear3 row, and the remaining biases stay f32.
    """
    mm_dtype = jnp.bfloat16 if use_bf16 else jnp.float32
    act_dtype = jnp.bfloat16 if (use_bf16 and bf16_epilogue) else jnp.float32
    f32 = jnp.float32

    def pad2(a, rows, cols):
        return jnp.pad(a, ((0, rows - a.shape[0]), (0, cols - a.shape[1])))

    w1 = params["conv1_w"][:, :, 1].T.astype(f32)                   # (4, 32)
    w2 = params["conv2_w"][:, :, 1].T.astype(mm_dtype)              # (32, 64)
    w3 = params["conv3_w"][:, :, 1].T.astype(mm_dtype)              # (64, 128)
    w4 = pad2(params["lin1_w"].T, 128, _PAD_N).astype(mm_dtype)     # (128, 256)
    w5 = pad2(params["lin2_w"].T, _PAD_N, _PAD_N).astype(mm_dtype)  # (256, 256)
    w6 = pad2(params["lin3_w"], 1, _PAD_N).astype(f32)              # (1, 256)

    b1 = params["conv1_b"][None, :].astype(f32)                     # (1, 32)
    b2 = params["conv2_b"][None, :].astype(act_dtype)               # (1, 64)
    b3 = params["conv3_b"][None, :].astype(act_dtype)               # (1, 128)
    b4 = jnp.pad(params["lin1_b"], (0, _PAD_N - 220))[None, :].astype(act_dtype)
    b5 = jnp.pad(params["lin2_b"], (0, _PAD_N - 220))[None, :].astype(act_dtype)
    b6 = params["lin3_b"].reshape(1, 1).astype(f32)                 # (1, 1)
    return (w1, b1, w2, b2, w3, b3, w4, b4, w5, b5, w6, b6)


def discriminator_forward(x, packed, *, max_tile_b=_MAX_TILE_B):
    """x: (B, 4, 1) float32 (NCL as in PyTorch Conv1d).  Returns (B, 1) f32."""
    assert x.ndim == 3 and x.shape[1] == 4 and x.shape[2] == 1, \
        "forward's reshape requires sequence length == 1"
    B = x.shape[0]
    x2d = x[:, :, 0].astype(jnp.float32)                            # (B, 4)

    kind = _device_kind()
    # Batch tiling: multiple of 128 (so the dense output slab divides evenly),
    # capped so VMEM stays bounded.
    tile_b = min(max_tile_b, _round_up(B, 128))
    if _is_v7x(kind) and B > 128:
        # Guarantee >= 2 grid steps so the "parallel" batch axis actually
        # spans both of v7x's TensorCores.
        tile_b = min(tile_b, max(128, _round_up(_cdiv(B, 2), 128)))
    b_pad = _round_up(B, tile_b)
    if b_pad != B:
        x2d = jnp.pad(x2d, ((0, b_pad - B), (0, 0)))
    num_tiles = b_pad // tile_b
    g = tile_b // 128

    (w1, b1, w2, b2, w3, b3, w4, b4, w5, b5, w6, b6) = packed
    weights = (w1, b1, w2, b2, w3, b3, w4, b4, w5, b5, w6, b6)

    def resident(arr):  # full-shape block, constant index -> DMA'd once
        nd = arr.ndim
        return pl.BlockSpec(arr.shape, lambda i, _nd=nd: (0,) * _nd)

    in_specs = [pl.BlockSpec((tile_b, 4), lambda i: (i, 0))]
    in_specs += [resident(a) for a in weights]
    # Lane-dense output slab: (num_tiles, tile_b//128, 128); second-minor block
    # dim equals the full array dim, last dim is 128.
    out_spec = pl.BlockSpec((1, g, 128), lambda i: (i, 0, 0))

    flops_per_row = 2 * (4 * 32 + 32 * 64 + 64 * 128
                         + 128 * _PAD_N + _PAD_N * _PAD_N + _PAD_N)
    weight_bytes = sum(int(a.size) * a.dtype.itemsize for a in weights)
    cost = pl.CostEstimate(
        flops=int(b_pad) * int(flops_per_row),
        transcendentals=int(b_pad),
        bytes_accessed=int(b_pad) * (4 * 4 + 4) + weight_bytes,
    )

    out = pl.pallas_call(
        discriminator_kernel,
        grid=(num_tiles,),
        in_specs=in_specs,
        out_specs=out_spec,
        out_shape=jax.ShapeDtypeStruct((num_tiles, g, 128), jnp.float32),
        compiler_params=pltpu.CompilerParams(
            dimension_semantics=("parallel",),
            vmem_limit_bytes=_VMEM_LIMIT),
        cost_estimate=cost,
    )(x2d, *weights)

    # (num_tiles, g, 128) row-major == rows [tile*tile_b + grp*128 + lane].
    return out.reshape(b_pad, 1)[:B]


def _reference_forward(x, params):
    """Plain-JAX f32 reference replicating the PyTorch forward (sig=True)."""
    x2d = x[:, :, 0]
    h = x2d @ params["conv1_w"][:, :, 1].T + params["conv1_b"]
    h = jnp.where(h > 0, h, 0.01 * h)
    h = h @ params["conv2_w"][:, :, 1].T + params["conv2_b"]
    h = jnp.where(h > 0, h, 0.01 * h)
    h = h @ params["conv3_w"][:, :, 1].T + params["conv3_b"]
    h = jnp.where(h > 0, h, 0.01 * h)
    h = h @ params["lin1_w"].T + params["lin1_b"]
    h = jnp.where(h > 0, h, 0.01 * h)
    h = h @ params["lin2_w"].T + params["lin2_b"]
    h = jnp.maximum(h, 0.0)
    h = h @ params["lin3_w"].T + params["lin3_b"]
    return jax.nn.sigmoid(h)


if __name__ == "__main__":
    key = jax.random.PRNGKey(0)
    k_params, k_x, k_x2, k_x3 = jax.random.split(key, 4)

    params = init_params(k_params)
    bf16_epi = _has_bf16_vpu()   # bf16 elementwise epilogue only on v6e/v7x+

    # Input: (batch=2, channels=4, length=1) — NCL; length must be 1.
    x = jax.random.normal(k_x, (2, 4, 1), dtype=jnp.float32)
    ref = _reference_forward(x, params)

    # fp32-matmul path: tight check against the plain-JAX reference.
    packed_f32 = pack_params(params, use_bf16=False)
    out_f32 = jax.block_until_ready(discriminator_forward(x, packed_f32))
    assert out_f32.shape == (2, 1)
    assert jnp.allclose(out_f32, ref, atol=1e-5, rtol=1e-5), (out_f32, ref)

    # bf16-matmul path (default, MXU-native): f32 accumulation, loose tolerance.
    packed_bf16 = pack_params(params, use_bf16=True, bf16_epilogue=bf16_epi)
    out_bf16 = jax.block_until_ready(discriminator_forward(x, packed_bf16))
    assert out_bf16.shape == (2, 1)
    assert jnp.allclose(out_bf16, ref, atol=5e-2, rtol=5e-2), (out_bf16, ref)

    # Ragged small batch exercises the padding path (grid=1, G=1).
    x2 = jax.random.normal(k_x2, (19, 4, 1), dtype=jnp.float32)
    out2 = jax.block_until_ready(discriminator_forward(x2, packed_bf16))
    ref2 = _reference_forward(x2, params)
    assert out2.shape == (19, 1)
    assert jnp.allclose(out2, ref2, atol=5e-2, rtol=5e-2), (out2, ref2)

    # Larger batch exercises the multi-tile grid and dense output relayout.
    x3 = jax.random.normal(k_x3, (2500, 4, 1), dtype=jnp.float32)
    out3 = jax.block_until_ready(discriminator_forward(x3, packed_bf16))
    ref3 = _reference_forward(x3, params)
    assert out3.shape == (2500, 1)
    assert jnp.allclose(out3, ref3, atol=5e-2, rtol=5e-2)

    print("KERNEL_OK")
</pallas_src>

<mosaic_0001>
module attributes {stable_mosaic.version = 11 : i64} {
  func.func @discriminator_kernel(%arg0: i32, %arg1: memref<128x4xf32, #tpu.memory_space<vmem>>, %arg2: memref<4x32xf32, #tpu.memory_space<vmem>>, %arg3: memref<1x32xf32, #tpu.memory_space<vmem>>, %arg4: memref<32x64xf32, #tpu.memory_space<vmem>>, %arg5: memref<1x64xf32, #tpu.memory_space<vmem>>, %arg6: memref<64x128xf32, #tpu.memory_space<vmem>>, %arg7: memref<1x128xf32, #tpu.memory_space<vmem>>, %arg8: memref<128x256xf32, #tpu.memory_space<vmem>>, %arg9: memref<1x256xf32, #tpu.memory_space<vmem>>, %arg10: memref<256x256xf32, #tpu.memory_space<vmem>>, %arg11: memref<1x256xf32, #tpu.memory_space<vmem>>, %arg12: memref<1x256xf32, #tpu.memory_space<vmem>>, %arg13: memref<1x1xf32, #tpu.memory_space<vmem>>, %arg14: memref<1x1x128xf32, #tpu.memory_space<vmem>>) attributes {dimension_semantics = [#tpu.dimension_semantics<parallel>], iteration_bounds = array<i64: 1>, scalar_prefetch = 0 : i64, scratch_operands = 0 : i64, tpu.core_type = #tpu.core_type<tc>, window_params = [{transform_indices = @transform_0, window_bounds = array<i64: 128, 4>}, {pipeline_mode = #tpu.pipeline_mode<synchronous>, transform_indices = @transform_1, window_bounds = array<i64: 4, 32>}, {pipeline_mode = #tpu.pipeline_mode<synchronous>, transform_indices = @transform_2, window_bounds = array<i64: 1, 32>}, {pipeline_mode = #tpu.pipeline_mode<synchronous>, transform_indices = @transform_3, window_bounds = array<i64: 32, 64>}, {pipeline_mode = #tpu.pipeline_mode<synchronous>, transform_indices = @transform_4, window_bounds = array<i64: 1, 64>}, {pipeline_mode = #tpu.pipeline_mode<synchronous>, transform_indices = @transform_5, window_bounds = array<i64: 64, 128>}, {pipeline_mode = #tpu.pipeline_mode<synchronous>, transform_indices = @transform_6, window_bounds = array<i64: 1, 128>}, {pipeline_mode = #tpu.pipeline_mode<synchronous>, transform_indices = @transform_7, window_bounds = array<i64: 128, 256>}, {pipeline_mode = #tpu.pipeline_mode<synchronous>, transform_indices = @transform_8, window_bounds = array<i64: 1, 256>}, {pipeline_mode = #tpu.pipeline_mode<synchronous>, transform_indices = @transform_9, window_bounds = array<i64: 256, 256>}, {pipeline_mode = #tpu.pipeline_mode<synchronous>, transform_indices = @transform_10, window_bounds = array<i64: 1, 256>}, {pipeline_mode = #tpu.pipeline_mode<synchronous>, transform_indices = @transform_11, window_bounds = array<i64: 1, 256>}, {pipeline_mode = #tpu.pipeline_mode<synchronous>, transform_indices = @transform_12, window_bounds = array<i64: 1, 1>}, {transform_indices = @transform_13, window_bounds = array<i64: 1, 1, 128>}]} {
    %c0 = arith.constant 0 : index
    %c0_0 = arith.constant 0 : index
    %0 = vector.load %arg1[%c0, %c0_0] : memref<128x4xf32, #tpu.memory_space<vmem>>, vector<128x4xf32>
    %c0_1 = arith.constant 0 : index
    %c0_2 = arith.constant 0 : index
    %1 = vector.load %arg2[%c0_1, %c0_2] : memref<4x32xf32, #tpu.memory_space<vmem>>, vector<4x32xf32>
    %c0_3 = arith.constant 0 : index
    %c0_4 = arith.constant 0 : index
    %2 = vector.load %arg3[%c0_3, %c0_4] : memref<1x32xf32, #tpu.memory_space<vmem>>, vector<1x32xf32>
    %3 = vector.extract_strided_slice %0 {offsets = [0, 0], sizes = [128, 1], strides = [1, 1]} : vector<128x4xf32> to vector<128x1xf32>
    %4 = vector.extract_strided_slice %1 {offsets = [0, 0], sizes = [1, 32], strides = [1, 1]} : vector<4x32xf32> to vector<1x32xf32>
    %5 = vector.broadcast %3 : vector<128x1xf32> to vector<128x32xf32>
    %6 = vector.broadcast %4 : vector<1x32xf32> to vector<128x32xf32>
    %7 = arith.mulf %5, %6 : vector<128x32xf32>
    %8 = vector.broadcast %2 : vector<1x32xf32> to vector<128x32xf32>
    %9 = arith.addf %8, %7 : vector<128x32xf32>
    %10 = vector.extract_strided_slice %0 {offsets = [0, 1], sizes = [128, 1], strides = [1, 1]} : vector<128x4xf32> to vector<128x1xf32>
    %11 = vector.extract_strided_slice %1 {offsets = [1, 0], sizes = [1, 32], strides = [1, 1]} : vector<4x32xf32> to vector<1x32xf32>
    %12 = vector.broadcast %10 : vector<128x1xf32> to vector<128x32xf32>
    %13 = vector.broadcast %11 : vector<1x32xf32> to vector<128x32xf32>
    %14 = arith.mulf %12, %13 : vector<128x32xf32>
    %15 = arith.addf %9, %14 : vector<128x32xf32>
    %16 = vector.extract_strided_slice %0 {offsets = [0, 2], sizes = [128, 1], strides = [1, 1]} : vector<128x4xf32> to vector<128x1xf32>
    %17 = vector.extract_strided_slice %1 {offsets = [2, 0], sizes = [1, 32], strides = [1, 1]} : vector<4x32xf32> to vector<1x32xf32>
    %18 = vector.broadcast %16 : vector<128x1xf32> to vector<128x32xf32>
    %19 = vector.broadcast %17 : vector<1x32xf32> to vector<128x32xf32>
    %20 = arith.mulf %18, %19 : vector<128x32xf32>
    %21 = arith.addf %15, %20 : vector<128x32xf32>
    %22 = vector.extract_strided_slice %0 {offsets = [0, 3], sizes = [128, 1], strides = [1, 1]} : vector<128x4xf32> to vector<128x1xf32>
    %23 = vector.extract_strided_slice %1 {offsets = [3, 0], sizes = [1, 32], strides = [1, 1]} : vector<4x32xf32> to vector<1x32xf32>
    %24 = vector.broadcast %22 : vector<128x1xf32> to vector<128x32xf32>
    %25 = vector.broadcast %23 : vector<1x32xf32> to vector<128x32xf32>
    %26 = arith.mulf %24, %25 : vector<128x32xf32>
    %27 = arith.addf %21, %26 : vector<128x32xf32>
    %cst = arith.constant 0.00999999977 : f32
    %28 = vector.broadcast %cst : f32 to vector<128x32xf32>
    %29 = arith.mulf %27, %28 : vector<128x32xf32>
    %30 = arith.maximumf %27, %29 : vector<128x32xf32>
    %c0_5 = arith.constant 0 : index
    %c0_6 = arith.constant 0 : index
    %31 = vector.load %arg4[%c0_5, %c0_6] : memref<32x64xf32, #tpu.memory_space<vmem>>, vector<32x64xf32>
    %cst_7 = arith.constant dense<0.000000e+00> : vector<128x64xf32>
    %32 = tpu.matmul %30, %31, %cst_7 {dimension_numbers = #tpu.dot_dimension_numbers<[1], [0], [0], [1], [0, 0, 1, 1], [], []>} : vector<128x32xf32>, vector<32x64xf32>, vector<128x64xf32> -> vector<128x64xf32>
    %c0_8 = arith.constant 0 : index
    %c0_9 = arith.constant 0 : index
    %33 = vector.load %arg5[%c0_8, %c0_9] : memref<1x64xf32, #tpu.memory_space<vmem>>, vector<1x64xf32>
    %34 = vector.broadcast %33 : vector<1x64xf32> to vector<128x64xf32>
    %35 = arith.addf %32, %34 : vector<128x64xf32>
    %cst_10 = arith.constant 0.00999999977 : f32
    %36 = vector.broadcast %cst_10 : f32 to vector<128x64xf32>
    %37 = arith.mulf %35, %36 : vector<128x64xf32>
    %38 = arith.maximumf %35, %37 : vector<128x64xf32>
    %c0_11 = arith.constant 0 : index
    %c0_12 = arith.constant 0 : index
    %39 = vector.load %arg6[%c0_11, %c0_12] : memref<64x128xf32, #tpu.memory_space<vmem>>, vector<64x128xf32>
    %cst_13 = arith.constant dense<0.000000e+00> : vector<128x128xf32>
    %40 = tpu.matmul %38, %39, %cst_13 {dimension_numbers = #tpu.dot_dimension_numbers<[1], [0], [0], [1], [0, 0, 1, 1], [], []>} : vector<128x64xf32>, vector<64x128xf32>, vector<128x128xf32> -> vector<128x128xf32>
    %c0_14 = arith.constant 0 : index
    %c0_15 = arith.constant 0 : index
    %41 = vector.load %arg7[%c0_14, %c0_15] : memref<1x128xf32, #tpu.memory_space<vmem>>, vector<1x128xf32>
    %42 = vector.broadcast %41 : vector<1x128xf32> to vector<128x128xf32>
    %43 = arith.addf %40, %42 : vector<128x128xf32>
    %cst_16 = arith.constant 0.00999999977 : f32
    %44 = vector.broadcast %cst_16 : f32 to vector<128x128xf32>
    %45 = arith.mulf %43, %44 : vector<128x128xf32>
    %46 = arith.maximumf %43, %45 : vector<128x128xf32>
    %c0_17 = arith.constant 0 : index
    %c0_18 = arith.constant 0 : index
    %47 = vector.load %arg8[%c0_17, %c0_18] : memref<128x256xf32, #tpu.memory_space<vmem>>, vector<128x256xf32>
    %cst_19 = arith.constant dense<0.000000e+00> : vector<128x256xf32>
    %48 = tpu.matmul %46, %47, %cst_19 {dimension_numbers = #tpu.dot_dimension_numbers<[1], [0], [0], [1], [0, 0, 1, 1], [], []>} : vector<128x128xf32>, vector<128x256xf32>, vector<128x256xf32> -> vector<128x256xf32>
    %c0_20 = arith.constant 0 : index
    %c0_21 = arith.constant 0 : index
    %49 = vector.load %arg9[%c0_20, %c0_21] : memref<1x256xf32, #tpu.memory_space<vmem>>, vector<1x256xf32>
    %50 = vector.broadcast %49 : vector<1x256xf32> to vector<128x256xf32>
    %51 = arith.addf %48, %50 : vector<128x256xf32>
    %cst_22 = arith.constant 0.00999999977 : f32
    %52 = vector.broadcast %cst_22 : f32 to vector<128x256xf32>
    %53 = arith.mulf %51, %52 : vector<128x256xf32>
    %54 = arith.maximumf %51, %53 : vector<128x256xf32>
    %c0_23 = arith.constant 0 : index
    %c0_24 = arith.constant 0 : index
    %55 = vector.load %arg10[%c0_23, %c0_24] : memref<256x256xf32, #tpu.memory_space<vmem>>, vector<256x256xf32>
    %cst_25 = arith.constant dense<0.000000e+00> : vector<128x256xf32>
    %56 = tpu.matmul %54, %55, %cst_25 {dimension_numbers = #tpu.dot_dimension_numbers<[1], [0], [0], [1], [0, 0, 1, 1], [], []>} : vector<128x256xf32>, vector<256x256xf32>, vector<128x256xf32> -> vector<128x256xf32>
    %c0_26 = arith.constant 0 : index
    %c0_27 = arith.constant 0 : index
    %57 = vector.load %arg11[%c0_26, %c0_27] : memref<1x256xf32, #tpu.memory_space<vmem>>, vector<1x256xf32>
    %58 = vector.broadcast %57 : vector<1x256xf32> to vector<128x256xf32>
    %59 = arith.addf %56, %58 : vector<128x256xf32>
    %cst_28 = arith.constant 0.000000e+00 : f32
    %60 = vector.broadcast %cst_28 : f32 to vector<128x256xf32>
    %61 = arith.maximumf %59, %60 : vector<128x256xf32>
    %c0_29 = arith.constant 0 : index
    %c0_30 = arith.constant 0 : index
    %62 = vector.load %arg12[%c0_29, %c0_30] : memref<1x256xf32, #tpu.memory_space<vmem>>, vector<1x256xf32>
    %63 = vector.broadcast %62 : vector<1x256xf32> to vector<128x256xf32>
    %64 = arith.mulf %61, %63 : vector<128x256xf32>
    %cst_31 = arith.constant dense<0.000000e+00> : vector<128xf32>
    %65 = vector.multi_reduction <add>, %64, %cst_31 [1] : vector<128x256xf32> to vector<128xf32>
    %66 = vector.shape_cast %65 : vector<128xf32> to vector<128x1xf32>
    %67 = vector.shape_cast %66 : vector<128x1xf32> to vector<1x128xf32>
    %c0_32 = arith.constant 0 : index
    %c0_33 = arith.constant 0 : index
    %68 = vector.load %arg13[%c0_32, %c0_33] : memref<1x1xf32, #tpu.memory_space<vmem>>, vector<1x1xf32>
    %69 = vector.broadcast %68 : vector<1x1xf32> to vector<1x128xf32>
    %70 = arith.addf %67, %69 : vector<1x128xf32>
    %71 = math.absf %70 : vector<1x128xf32>
    %cst_34 = arith.constant 0.000000e+00 : f32
    %72 = vector.broadcast %cst_34 : f32 to vector<1x128xf32>
    %73 = arith.subf %72, %71 : vector<1x128xf32>
    %74 = math.exp %73 : vector<1x128xf32>
    %cst_35 = arith.constant 0.000000e+00 : f32
    %75 = vector.broadcast %cst_35 : f32 to vector<1x128xf32>
    %76 = arith.cmpf oge, %70, %75 : vector<1x128xf32>
    %cst_36 = arith.constant 1.000000e+00 : f32
    %77 = vector.broadcast %cst_36 : f32 to vector<1x128xf32>
    %78 = arith.select %76, %77, %74 : vector<1x128xi1>, vector<1x128xf32>
    %cst_37 = arith.constant 1.000000e+00 : f32
    %79 = vector.broadcast %cst_37 : f32 to vector<1x128xf32>
    %80 = arith.addf %79, %74 : vector<1x128xf32>
    %81 = arith.divf %78, %80 : vector<1x128xf32>
    %c0_38 = arith.constant 0 : index
    %c0_39 = arith.constant 0 : index
    %c0_40 = arith.constant 0 : index
    %82 = vector.load %arg14[%c0_38, %c0_39, %c0_40] : memref<1x1x128xf32, #tpu.memory_space<vmem>>, vector<1x1x128xf32>
    %83 = vector.shape_cast %82 : vector<1x1x128xf32> to vector<1x128xf32>
    %84 = vector.shape_cast %81 : vector<1x128xf32> to vector<1x1x128xf32>
    tpu.vector_store %arg14[%c0_38, %c0_39, %c0_40], %84 {strides = array<i32>} : memref<1x1x128xf32, #tpu.memory_space<vmem>>, vector<1x1x128xf32>,
    return
  }
  func.func @transform_0(%arg0: i32) -> (i32, i32) {
    %c0_i32 = arith.constant 0 : i32
    %c0_i32_0 = arith.constant 0 : i32
    return %arg0, %c0_i32 : i32, i32
  }
  func.func @transform_1(%arg0: i32) -> (i32, i32) {
    %c0_i32 = arith.constant 0 : i32
    %c0_i32_0 = arith.constant 0 : i32
    %c0_i32_1 = arith.constant 0 : i32
    return %c0_i32, %c0_i32_0 : i32, i32
  }
  func.func @transform_2(%arg0: i32) -> (i32, i32) {
    %c0_i32 = arith.constant 0 : i32
    %c0_i32_0 = arith.constant 0 : i32
    %c0_i32_1 = arith.constant 0 : i32
    return %c0_i32, %c0_i32_0 : i32, i32
  }
  func.func @transform_3(%arg0: i32) -> (i32, i32) {
    %c0_i32 = arith.constant 0 : i32
    %c0_i32_0 = arith.constant 0 : i32
    %c0_i32_1 = arith.constant 0 : i32
    return %c0_i32, %c0_i32_0 : i32, i32
  }
  func.func @transform_4(%arg0: i32) -> (i32, i32) {
    %c0_i32 = arith.constant 0 : i32
    %c0_i32_0 = arith.constant 0 : i32
    %c0_i32_1 = arith.constant 0 : i32
    return %c0_i32, %c0_i32_0 : i32, i32
  }
  func.func @transform_5(%arg0: i32) -> (i32, i32) {
    %c0_i32 = arith.constant 0 : i32
    %c0_i32_0 = arith.constant 0 : i32
    %c0_i32_1 = arith.constant 0 : i32
    return %c0_i32, %c0_i32_0 : i32, i32
  }
  func.func @transform_6(%arg0: i32) -> (i32, i32) {
    %c0_i32 = arith.constant 0 : i32
    %c0_i32_0 = arith.constant 0 : i32
    %c0_i32_1 = arith.constant 0 : i32
    return %c0_i32, %c0_i32_0 : i32, i32
  }
  func.func @transform_7(%arg0: i32) -> (i32, i32) {
    %c0_i32 = arith.constant 0 : i32
    %c0_i32_0 = arith.constant 0 : i32
    %c0_i32_1 = arith.constant 0 : i32
    return %c0_i32, %c0_i32_0 : i32, i32
  }
  func.func @transform_8(%arg0: i32) -> (i32, i32) {
    %c0_i32 = arith.constant 0 : i32
    %c0_i32_0 = arith.constant 0 : i32
    %c0_i32_1 = arith.constant 0 : i32
    return %c0_i32, %c0_i32_0 : i32, i32
  }
  func.func @transform_9(%arg0: i32) -> (i32, i32) {
    %c0_i32 = arith.constant 0 : i32
    %c0_i32_0 = arith.constant 0 : i32
    %c0_i32_1 = arith.constant 0 : i32
    return %c0_i32, %c0_i32_0 : i32, i32
  }
  func.func @transform_10(%arg0: i32) -> (i32, i32) {
    %c0_i32 = arith.constant 0 : i32
    %c0_i32_0 = arith.constant 0 : i32
    %c0_i32_1 = arith.constant 0 : i32
    return %c0_i32, %c0_i32_0 : i32, i32
  }
  func.func @transform_11(%arg0: i32) -> (i32, i32) {
    %c0_i32 = arith.constant 0 : i32
    %c0_i32_0 = arith.constant 0 : i32
    %c0_i32_1 = arith.constant 0 : i32
    return %c0_i32, %c0_i32_0 : i32, i32
  }
  func.func @transform_12(%arg0: i32) -> (i32, i32) {
    %c0_i32 = arith.constant 0 : i32
    %c0_i32_0 = arith.constant 0 : i32
    %c0_i32_1 = arith.constant 0 : i32
    return %c0_i32, %c0_i32_0 : i32, i32
  }
  func.func @transform_13(%arg0: i32) -> (i32, i32, i32) {
    %c0_i32 = arith.constant 0 : i32
    %c0_i32_0 = arith.constant 0 : i32
    %c0_i32_1 = arith.constant 0 : i32
    return %arg0, %c0_i32, %c0_i32_0 : i32, i32, i32
  }
}

</mosaic_0001>

<bundles_post_ra>
// kernel: tpu_custom_call.1
= control target key start
LH: loop header
LB: loop body
LE: loop exit
PB: predicated region body
PF: predicated region fallthrough
CT: control target
= control target key end

     0   :  { %s3350_s0 = inlined_call_operand.vmem [shape: f32[128,4], index: 0, kind: input, shape index: {}]   ;;  %s3351_s1 = inlined_call_operand.vmem [shape: f32[4,32], index: 1, kind: input, shape index: {}]   ;;  %s3352_s2 = inlined_call_operand.vmem [shape: f32[1,32], index: 2, kind: input, shape index: {}]   ;;  %s3353_s3 = inlined_call_operand.vmem [shape: f32[32,64], index: 3, kind: input, shape index: {}]   ;;  %s3354_s4 = inlined_call_operand.vmem [shape: f32[1,64], index: 4, kind: input, shape index: {}]   ;;  %s3355_s5 = inlined_call_operand.vmem [shape: f32[64,128], index: 5, kind: input, shape index: {}]   ;;  %s3356_s6 = inlined_call_operand.vmem [shape: f32[1,128], index: 6, kind: input, shape index: {}]   ;;  %s3357_s7 = inlined_call_operand.hbm [shape: f32[128,256], index: 7, kind: input, shape index: {}]   ;;  %s3358_s8 = inlined_call_operand.vmem [shape: f32[1,256], index: 8, kind: input, shape index: {}]   ;;  %s3359_s9 = inlined_call_operand.hbm [shape: f32[256,256], index: 9, kind: input, shape index: {}]   ;;  %s3360_s10 = inlined_call_operand.vmem [shape: f32[1,256], index: 10, kind: input, shape index: {}]   ;;  %s3361_s11 = inlined_call_operand.vmem [shape: f32[1,256], index: 11, kind: input, shape index: {}]   ;;  %s3362_s12 = inlined_call_operand.<no memory space> [shape: f32[1,1], index: 12, kind: input, shape index: {}]   ;;  %s3363_s13 = inlined_call_operand.hbm [shape: f32[1,1,128], index: 13, kind: output, shape index: {}]  }
   0x1   :  { %v18_v0 = vstv %s3362_s12 }
   0x2   :  { %19 = vst [vmem:[#allocation2] sm:$0x1] %v18_v0 }
   0x3   :  { %20 = vsyncpa [#allocation4], 0 }
   0x4   :  { %21 = vsyncpa [#allocation7], 0 }
   0x5   :  { %22 = vsyncpa [#allocation5], 0  ;;  %s2459_s27 = smov [#allocation3]   ;;  %s2387_s14 = scalar_lea.hbm %s3357_s7, 4096 }
   0x6   :  { %s42_s28 = sshll.u32 %s2459_s27, 4  ;;  %p2388_p0 = scmp.ne.s32.totalorder %s3357_s7, %s2387_s14  ;;  %s43_s28 = int_to_ptr.vmem [resolvable:$true] %s42_s28 }
   0x7   :  { %p2391_p1 = scmp.lt.u32.totalorder %s2387_s14, %s3357_s7 }
   0x9   :  { %p2393_p2 = pnand %p2391_p1, %p2388_p0 }
   0xb   :  { %2396 = shalt.err (!%p2393_p2)
}
   0xc   :  { %s2397_s12 = scalar_lea.vmem %s43_s28, 4096  ;;  %p2402_p4 = scmp.lt.s32.totalorder %s43_s28, %s43_s28 }
   0xd   :  { %p2398_p3 = scmp.ne.s32.totalorder %s43_s28, %s2397_s12  ;;  %p2403_p5 = scmp.lt.s32.totalorder %s2397_s12, %s2397_s12 }
   0xf   :  { %p2404_p6 = por %p2403_p5, %p2402_p4 }
  0x11   :  { %p2405_p7 = pnand %p2404_p6, %p2398_p3 }
  0x13   :  { %2408 = shalt.err (!%p2405_p7)
}
  0x14   :  { %s2460_s19 = smov 256   ;;  %s2461_s20 = smov 16  }
  0x15   :  { %48 = dma.hbm_to_vmem [thread:$0]  %s3357_s7, 4096, %s43_s28, [#allocation4], %s2460_s19, %s2460_s19, %s2461_s20  }
  0x16   :  { %s2462_s23 = smov [#allocation6]   ;;  %s2409_s27 = scalar_lea.hbm %s3359_s9, 8192 }
  0x17   :  { %s56_s24 = sshll.u32 %s2462_s23, 4  ;;  %p2410_p8 = scmp.ne.s32.totalorder %s3359_s9, %s2409_s27  ;;  %s57_s24 = int_to_ptr.vmem [resolvable:$true] %s56_s24 }
  0x18   :  { %p2413_p9 = scmp.lt.u32.totalorder %s2409_s27, %s3359_s9 }
  0x1a   :  { %p2415_p10 = pnand %p2413_p9, %p2410_p8 }
  0x1c   :  { %2418 = shalt.err (!%p2415_p10)
}
  0x1d   :  { %s2419_s16 = scalar_lea.vmem %s57_s24, 8192  ;;  %p2424_p12 = scmp.lt.s32.totalorder %s57_s24, %s57_s24 }
  0x1e   :  { %p2420_p11 = scmp.ne.s32.totalorder %s57_s24, %s2419_s16  ;;  %p2425_p13 = scmp.lt.s32.totalorder %s2419_s16, %s2419_s16 }
  0x20   :  { %p2426_p0 = por %p2425_p13, %p2424_p12 }
  0x22   :  { %p2427_p1 = pnand %p2426_p0, %p2420_p11 }
  0x24   :  { %2430 = shalt.err (!%p2427_p1)
}
  0x25   :  { %62 = dma.hbm_to_vmem [thread:$0]  %s3359_s9, 8192, %s57_s24, [#allocation7], %s2460_s19, %s2460_s19, %s2461_s20  }
  0x26   :  { %2453 = dma.done.wait [#allocation4], 4096  }
  0x27   :  { %2454 = vsyncadd [#allocation4], 4294963200 }
  0x28   :  { %2455 = dma.done.wait [#allocation7], 8192  }
  0x29   :  { %2456 = vsyncadd [#allocation7], 4294959104  ;;  %v2463_v1 = vmov 2   ;;  %v2464_v2 = vmov 1   ;;  %v75_v3 = vld [vmem:[%s3350_s0] sm:$0xff]  ;;  %v78_v4 = vld [vmem:[%s3350_s0 + $0x18] sm:$0xff]  ;;  %v173_v38 = vlaneseq }
  0x2a   :  { %2284 = vset.pattern.permute.xlu0 %v2463_v1  ;;  %2283 = vset.pattern.permute.xlu1 %v2464_v2  ;;  %v76_v5 = vld [vmem:[%s3350_s0 + $0x8] sm:$0xff]  ;;  %v2465_v6 = vmov 3   ;;  %v79_v7 = vld [vmem:[%s3350_s0 + $0x20] sm:$0xff]  ;;  %v2586_v8 = vld [vmem:[%s3350_s0 + $0x38] sm:$0xff]  ;;  %v2466_v10 = vmov 0   ;;  %vm558_vm0 = vcmask 261120  }
  0x2b   :  { %316 = vperm.xlu0 %2284, %v75_v3   ;;  %216 = vperm.xlu1 %2283, %v75_v3   ;;  %v77_v9 = vld [vmem:[%s3350_s0 + $0x10] sm:$0xff]  ;;  %v80_v11 = vld [vmem:[%s3350_s0 + $0x28] sm:$0xff]  ;;  %v2601_v12 = vld [vmem:[%s3350_s0 + $0x40] sm:$0xff]  ;;  %v2704_v41 = vshrl.u32 %v173_v38, 7  ;;  %vm799_vm1 = vcmask 523264   ;;  %vm1852_vm2 = vcmask 130112  }
  0x2c   :  { %v2607_v13 = vld [vmem:[%s3350_s0 + $0x58] sm:$0xff]  ;;  %v547_v14 = vld [vmem:[%s3353_s3] sm:$0xff]  ;;  %v548_v15 = vld [vmem:[%s3353_s3 + $0x8] sm:$0xff]  ;;  %vm1859_vm5 = vcmask 195712   ;;  %vm1866_vm7 = vcmask 261312   ;;  %vm1873_vm8 = vcmask 326912  }
  0x2d   :  { %v2121_v16 = vpack.c.bf16 %v548_v15, %v547_v14  ;;  %v549_v17 = vld [vmem:[%s3353_s3 + $0x10] sm:$0xff]  ;;  %v550_v18 = vld [vmem:[%s3353_s3 + $0x18] sm:$0xff]  ;;  %v2635_v21 = vld [vmem:[%s3350_s0 + $0x68] sm:$0xff]  ;;  %v2707_v43 = vsub.s32 0, %v2704_v41  ;;  %v2720_v48 = vsub.s32 1, %v2704_v41  ;;  %v381_v50 = vsub.s32 2, %v2704_v41 }
  0x2e   :  { %v2125_v19 = vpack.c.bf16 %v550_v18, %v549_v17  ;;  %v85_v20 = vld [vmem:[%s3350_s0 + $0x50] sm:$0xff]  ;;  %v84_v23 = vld [vmem:[%s3350_s0 + $0x48] sm:$0xff]  ;;  %v2649_v24 = vld [vmem:[%s3350_s0 + $0x60] sm:$0xff]  ;;  %v481_v51 = vsub.s32 3, %v2704_v41  ;;  %vm1880_vm12 = vcmask 392512   ;;  %vm1887_vm13 = vcmask 458112  }
  0x2f   :  { %328 = vperm.xlu0 %2284, %v78_v4   ;;  %220 = vperm.xlu1 %2283, %v76_v5   ;;  %v81_v22 = vld [vmem:[%s3350_s0 + $0x30] sm:$0xff]  ;;  %v2670_v26 = vld [vmem:[%s3350_s0 + $0x78] sm:$0xff]  ;;  %v91_v45 = vld [vmem:[%s3351_s1] sm:$0xf]  ;;  %vm1894_vm15 = vcmask 523712  }
  0x30   :  { %2122 = vmatprep.subr.bf16.mxu0 %v2121_v16  ;;  %v2662_v25 = vld [vmem:[%s3350_s0 + $0x70] sm:$0xff]  ;;  %v2716_v46 = vrot.slane %v91_v45, %v2707_v43  ;;  %v2729_v53 = vrot.slane %v91_v45, %v2720_v48  ;;  %v2734_v54 = vld [vmem:[%s3352_s2] ss:$0 sm:$0xff]  ;;  %v2738_v57 = vrot.slane %v91_v45, %v381_v50  ;;  %v2742_v60 = vrot.slane %v91_v45, %v481_v51 }
  0x31   :  { %2124 = vmatpush3.bf16.msra.mxu0 %v2121_v16 }
  0x32   :  { %2126 = vmatprep.subr.bf16.mxu0 %v2125_v19 }
  0x33   :  { %2290 = vset.pattern.permute.xlu0 %v2465_v6  ;;  %2285 = vset.pattern.permute.xlu1 %v2463_v1 }
  0x34   :  { %420 = vperm.xlu0 %2290, %v76_v5   ;;  %320 = vperm.xlu1 %2285, %v76_v5  }
  0x35   :  { %2128 = vmatpush3.bf16.msra.mxu0 %v2125_v19 }
  0x38   :  { %432 = vperm.xlu0 %2290, %v79_v7   ;;  %2286 = vset.pattern.permute.xlu1 %v2465_v6 }
  0x39   :  { %416 = vperm.xlu1 %2286, %v75_v3  }
  0x3c   :  { %444 = vperm.xlu0 %2290, %v2586_v8  }
  0x3d   :  { %2287 = vset.pattern.permute.xlu1 %v2466_v10 }
  0x3e   :  { %105 = vperm.xlu1 %2287, %v77_v9  }
  0x40   :  { %2300 = vset.pattern.permute.xlu0 %v2464_v2 }
  0x41   :  { %224 = vperm.xlu0 %2300, %v77_v9  }
  0x42   :  { %110 = vperm.xlu1 %2287, %v78_v4  }
  0x45   :  { %236 = vperm.xlu0 %2300, %v80_v11  }
  0x46   :  { %2288 = vset.pattern.permute.xlu1 %v2464_v2 }
  0x47   :  { %228 = vperm.xlu1 %2288, %v78_v4  }
  0x49   :  { %248 = vperm.xlu0 %2300, %v2601_v12  }
  0x4b   :  { %2289 = vset.pattern.permute.xlu1 %v2463_v1 }
  0x4c   :  { %324 = vperm.xlu1 %2289, %v77_v9  }
  0x4d   :  { %260 = vperm.xlu0 %2300, %v2607_v13  }
  0x50   :  { %2291 = vset.pattern.permute.xlu1 %v2465_v6 }
  0x51   :  { %2307 = vset.pattern.permute.xlu0 %v2466_v10  ;;  %424 = vperm.xlu1 %2291, %v77_v9  }
  0x52   :  { %95 = vperm.xlu0 %2307, %v75_v3  }
  0x55   :  { %428 = vperm.xlu1 %2291, %v78_v4  }
  0x56   :  { %100 = vperm.xlu0 %2307, %v76_v5  }
  0x59   :  { %2292 = vset.pattern.permute.xlu1 %v2466_v10 }
  0x5a   :  { %120 = vperm.xlu1 %2292, %v80_v11   ;;  %115 = vperm.xlu0 %2307, %v79_v7  }
  0x5e   :  { %2293 = vset.pattern.permute.xlu1 %v2464_v2  ;;  %130 = vperm.xlu0 %2307, %v2586_v8  }
  0x5f   :  { %232 = vperm.xlu1 %2293, %v79_v7  }
  0x62   :  { %145 = vperm.xlu0 %2307, %v85_v20  }
  0x63   :  { %2294 = vset.pattern.permute.xlu1 %v2463_v1 }
  0x64   :  { %332 = vperm.xlu1 %2294, %v79_v7  }
  0x66   :  { %160 = vperm.xlu0 %2307, %v2635_v21  }
  0x68   :  { %336 = vperm.xlu1 %2294, %v80_v11  }
  0x6a   :  { %2311 = vset.pattern.permute.xlu0 %v2463_v1 }
  0x6b   :  { %340 = vperm.xlu0 %2311, %v81_v22  }
  0x6c   :  { %2295 = vset.pattern.permute.xlu1 %v2465_v6 }
  0x6d   :  { %436 = vperm.xlu1 %2295, %v80_v11  }
  0x6f   :  { %352 = vperm.xlu0 %2311, %v84_v23  }
  0x71   :  { %2296 = vset.pattern.permute.xlu1 %v2466_v10 }
  0x72   :  { %125 = vperm.xlu1 %2296, %v81_v22  }
  0x73   :  { %364 = vperm.xlu0 %2311, %v2649_v24  }
  0x76   :  { %2297 = vset.pattern.permute.xlu1 %v2464_v2 }
  0x77   :  { %240 = vperm.xlu1 %2297, %v81_v22   ;;  %2313 = vset.pattern.permute.xlu0 %v2465_v6 }
  0x78   :  { %456 = vperm.xlu0 %2313, %v85_v20  }
  0x7b   :  { %244 = vperm.xlu1 %2297, %v2586_v8  }
  0x7c   :  { %468 = vperm.xlu0 %2313, %v2635_v21  }
  0x7f   :  { %2298 = vset.pattern.permute.xlu1 %v2463_v1 }
  0x80   :  { %344 = vperm.xlu1 %2298, %v2586_v8   ;;  %2317 = vset.pattern.permute.xlu0 %v2464_v2 }
  0x81   :  { %272 = vperm.xlu0 %2317, %v2662_v25  }
  0x84   :  { %2299 = vset.pattern.permute.xlu1 %v2465_v6 }
  0x85   :  { %440 = vperm.xlu1 %2299, %v81_v22   ;;  %2320 = vset.pattern.permute.xlu0 %v2463_v1 }
  0x86   :  { %376 = vperm.xlu0 %2320, %v2670_v26  }
  0x89   :  { %2301 = vset.pattern.permute.xlu1 %v2466_v10 }
  0x8a   :  { %135 = vperm.xlu1 %2301, %v2601_v12   ;;  %2322 = vset.pattern.permute.xlu0 %v2466_v10 }
  0x8e   :  { %140 = vperm.xlu1 %2301, %v84_v23  }
  0x92   :  { %2302 = vset.pattern.permute.xlu1 %v2464_v2 }
  0x93   :  { %252 = vperm.xlu1 %2302, %v84_v23  }
  0x97   :  { %2303 = vset.pattern.permute.xlu1 %v2463_v1 }
  0x98   :  { %348 = vperm.xlu1 %2303, %v2601_v12  }
  0x9c   :  { %2304 = vset.pattern.permute.xlu1 %v2465_v6 }
  0x9d   :  { %448 = vperm.xlu1 %2304, %v2601_v12  }
  0xa1   :  { %452 = vperm.xlu1 %2304, %v84_v23  }
  0xa5   :  { %2305 = vset.pattern.permute.xlu1 %v2466_v10 }
  0xa6   :  { %150 = vperm.xlu1 %2305, %v2607_v13  }
  0xaa   :  { %2306 = vset.pattern.permute.xlu1 %v2464_v2  ;;  %v217_v27 = vpop.permute.xlu1 %216  ;;  %v317_v28 = vpop.permute.xlu0 %316 }
  0xab   :  { %256 = vperm.xlu1 %2306, %v85_v20   ;;  %v283_v63 = vmul.f32 %v2729_v53, %v217_v27  ;;  %v383_v0 = vmul.f32 %v2738_v57, %v317_v28 }
  0xae   :  { %v221_v29 = vpop.permute.xlu1 %220  ;;  %v329_v30 = vpop.permute.xlu0 %328 }
  0xaf   :  { %2308 = vset.pattern.permute.xlu1 %v2463_v1  ;;  %v386_v14 = vmul.f32 %v2738_v57, %v329_v30 }
  0xb0   :  { %356 = vperm.xlu1 %2308, %v85_v20  }
  0xb3   :  { %v2686_v31 = vpop.permute.xlu1 %320  ;;  %v2688_v32 = vpop.permute.xlu0 %420 }
  0xb4   :  { %360 = vperm.xlu1 %2308, %v2607_v13   ;;  %v384_v20 = vmul.f32 %v2738_v57, %v2686_v31 }
  0xb7   :  { %v2691_v33 = vpop.permute.xlu0 %432 }
  0xb8   :  { %2309 = vset.pattern.permute.xlu1 %v2465_v6  ;;  %v417_v34 = vpop.permute.xlu1 %416 }
  0xb9   :  { %460 = vperm.xlu1 %2309, %v2607_v13   ;;  %v284_v13 = vmul.f32 %v2729_v53, %v221_v29  ;;  %v483_v17 = vmul.f32 %v2742_v60, %v417_v34 }
  0xbb   :  { %v2695_v35 = vpop.permute.xlu0 %444 }
  0xbd   :  { %2310 = vset.pattern.permute.xlu1 %v2466_v10  ;;  %v106_v36 = vpop.permute.xlu1 %105 }
  0xbe   :  { %155 = vperm.xlu1 %2310, %v2649_v24   ;;  %v179_v52 = vmul.f32 %v2716_v46, %v106_v36 }
  0xc0   :  { %v225_v37 = vpop.permute.xlu0 %224  ;;  %v201_v61 = vadd.f32 %v2734_v54, %v179_v52 }
  0xc1   :  { %v111_v39 = vpop.permute.xlu1 %110  ;;  %v285_v62 = vmul.f32 %v2729_v53, %v225_v37 }
  0xc2   :  { %2312 = vset.pattern.permute.xlu1 %v2464_v2  ;;  %v180_v58 = vmul.f32 %v2716_v46, %v111_v39 }
  0xc3   :  { %264 = vperm.xlu1 %2312, %v2649_v24   ;;  %v301_v15 = vadd.f32 %v285_v62, %v201_v61  ;;  %v487_v61 = vmul.f32 %v2742_v60, %v2691_v33 }
  0xc4   :  { %v2701_v40 = vpop.permute.xlu0 %236  ;;  %v202_v9 = vadd.f32 %v2734_v54, %v180_v58 }
  0xc6   :  { %v229_v42 = vpop.permute.xlu1 %228 }
  0xc7   :  { %268 = vperm.xlu1 %2312, %v2635_v21   ;;  %v286_v3 = vmul.f32 %v2729_v53, %v229_v42 }
  0xc8   :  { %v2710_v44 = vpop.permute.xlu0 %248 }
  0xc9   :  { %v302_v18 = vadd.f32 %v286_v3, %v202_v9 }
  0xcb   :  { %2314 = vset.pattern.permute.xlu1 %v2463_v1  ;;  %v325_v47 = vpop.permute.xlu1 %324  ;;  %v402_v34 = vadd.f32 %v386_v14, %v302_v18 }
  0xcc   :  { %368 = vperm.xlu1 %2314, %v2635_v21   ;;  %v2723_v49 = vpop.permute.xlu0 %260  ;;  %v385_v7 = vmul.f32 %v2738_v57, %v325_v47 }
  0xce   :  { %v401_v21 = vadd.f32 %v385_v7, %v301_v15 }
  0xd0   :  { %2315 = vset.pattern.permute.xlu1 %v2465_v6  ;;  %v425_v55 = vpop.permute.xlu1 %424 }
  0xd1   :  { %v96_v56 = vpop.permute.xlu0 %95  ;;  %464 = vperm.xlu1 %2315, %v2649_v24   ;;  %v485_v16 = vmul.f32 %v2742_v60, %v425_v55  ;;  %v484_v24 = vmul.f32 %v2742_v60, %v2688_v32 }
  0xd2   :  { %v177_v59 = vmul.f32 %v2716_v46, %v96_v56 }
  0xd3   :  { %v501_v30 = vadd.f32 %v485_v16, %v401_v21  ;;  %v787_v21 = vld [vmem:[%s3355_s5 + $0x18] sm:$0xff] }
  0xd4   :  { %v199_v4 = vadd.f32 %v2734_v54, %v177_v59  ;;  %v429_v5 = vpop.permute.xlu1 %428 }
  0xd5   :  { %v101_v8 = vpop.permute.xlu0 %100  ;;  %2316 = vset.pattern.permute.xlu1 %v2466_v10  ;;  %v486_v27 = vmul.f32 %v2742_v60, %v429_v5  ;;  %v517_v32 = vmul.f32 0.01, %v501_v30 }
  0xd6   :  { %v299_v11 = vadd.f32 %v283_v63, %v199_v4  ;;  %v178_v12 = vmul.f32 %v2716_v46, %v101_v8  ;;  %165 = vperm.xlu1 %2316, %v2662_v25   ;;  %v288_v4 = vmul.f32 %v2729_v53, %v2701_v40 }
  0xd7   :  { %v502_v31 = vadd.f32 %v486_v27, %v402_v34  ;;  %v533_v58 = vmax.f32 %v501_v30, %v517_v32 }
  0xd8   :  { %v200_v19 = vadd.f32 %v2734_v54, %v178_v12  ;;  %v399_v10 = vadd.f32 %v383_v0, %v299_v11 }
  0xd9   :  { %v121_v22 = vpop.permute.xlu1 %120  ;;  %v116_v23 = vpop.permute.xlu0 %115  ;;  %v518_v55 = vmul.f32 0.01, %v502_v31 }
  0xda   :  { %v300_v28 = vadd.f32 %v284_v13, %v200_v19  ;;  %170 = vperm.xlu1 %2316, %v2670_v26   ;;  %v499_v29 = vadd.f32 %v483_v17, %v399_v10  ;;  %v181_v37 = vmul.f32 %v2716_v46, %v116_v23  ;;  %v182_v59 = vmul.f32 %v2716_v46, %v121_v22  ;;  %v785_v19 = vld [vmem:[%s3355_s5 + $0x8] sm:$0xff] }
  0xdb   :  { %v534_v0 = vmax.f32 %v502_v31, %v518_v55  ;;  %v490_v31 = vmul.f32 %v2742_v60, %v2695_v35 }
  0xdc   :  { %v400_v36 = vadd.f32 %v384_v20, %v300_v28  ;;  %v515_v39 = vmul.f32 0.01, %v499_v29  ;;  %v203_v50 = vadd.f32 %v2734_v54, %v181_v37 }
  0xdd   :  { %v131_v12 = vpop.permute.xlu0 %130 }
  0xde   :  { %v500_v42 = vadd.f32 %v484_v24, %v400_v36  ;;  %2318 = vset.pattern.permute.xlu1 %v2464_v2  ;;  %v233_v45 = vpop.permute.xlu1 %232  ;;  %v531_v47 = vmax.f32 %v499_v29, %v515_v39  ;;  %v184_v23 = vmul.f32 %v2716_v46, %v131_v12 }
  0xdf   :  { %276 = vperm.xlu1 %2318, %v2670_v26   ;;  %v287_v51 = vmul.f32 %v2729_v53, %v233_v45 }
  0xe0   :  { %2057 = vmatprep.mubr.msk.f32.mxu0 %vm558_vm0, %v531_v47  ;;  %v516_v52 = vmul.f32 0.01, %v500_v42  ;;  %v206_v29 = vadd.f32 %v2734_v54, %v184_v23 }
  0xe1   :  { %v303_v62 = vadd.f32 %v287_v51, %v203_v50  ;;  %v2790_v17 = vpop.permute.xlu0 %145 }
  0xe2   :  { %v532_v56 = vmax.f32 %v500_v42, %v516_v52 }
  0xe3   :  { %2319 = vset.pattern.permute.xlu1 %v2463_v1  ;;  %v333_v2 = vpop.permute.xlu1 %332  ;;  %v204_v1 = vadd.f32 %v2734_v54, %v182_v59 }
  0xe4   :  { %v387_v63 = vmul.f32 %v2738_v57, %v333_v2  ;;  %372 = vperm.xlu1 %2319, %v2662_v25   ;;  %2058 = vmatmul.mubr.msk.f32.vlgmr.msra.gmra.mrb[0].mxu0 %vm558_vm0, %v532_v56 }
  0xe5   :  { %2060 = vmatprep.mubr.msk.f32.mxu0 %vm558_vm0, %v533_v58  ;;  %v304_v9 = vadd.f32 %v288_v4, %v204_v1  ;;  %v2806_v24 = vpop.permute.xlu0 %160  ;;  %v291_v4 = vmul.f32 %v2729_v53, %v2710_v44 }
  0xe6   :  { %v403_v3 = vadd.f32 %v387_v63, %v303_v62 }
  0xe7   :  { %v337_v5 = vpop.permute.xlu1 %336 }
  0xe8   :  { %v503_v7 = vadd.f32 %v487_v61, %v403_v3  ;;  %2321 = vset.pattern.permute.xlu1 %v2465_v6  ;;  %2061 = vmatmul.mubr.msk.f32.gmra.mrb[2].mxu0 %vm558_vm0, %v534_v0  ;;  %v388_v33 = vmul.f32 %v2738_v57, %v337_v5 }
  0xe9   :  { %472 = vperm.xlu1 %2321, %v2662_v25   ;;  %v784_v25 = vld [vmem:[%s3355_s5] sm:$0xff] }
  0xea   :  { %v519_v8 = vmul.f32 0.01, %v503_v7  ;;  %v404_v14 = vadd.f32 %v388_v33, %v304_v9  ;;  %v2129_v20 = vpack.c.bf16 %v785_v19, %v784_v25  ;;  %v341_v36 = vpop.permute.xlu0 %340 }
  0xeb   :  { %v389_v32 = vmul.f32 %v2738_v57, %v341_v36 }
  0xec   :  { %v535_v11 = vmax.f32 %v503_v7, %v519_v8  ;;  %v437_v13 = vpop.permute.xlu1 %436  ;;  %2130 = vmatprep.subr.bf16.mxu1 %v2129_v20 }
  0xed   :  { %v488_v40 = vmul.f32 %v2742_v60, %v437_v13  ;;  %476 = vperm.xlu1 %2321, %v2670_v26   ;;  %v786_v26 = vld [vmem:[%s3355_s5 + $0x10] sm:$0xff]  ;;  %2132 = vmatpush3.bf16.msra.mxu1 %v2129_v20 }
  0xee   :  { %2063 = vmatprep.mubr.msk.f32.mxu0 %vm558_vm0, %v535_v11  ;;  %v2133_v22 = vpack.c.bf16 %v787_v21, %v786_v26  ;;  %v353_v9 = vpop.permute.xlu0 %352 }
  0xef   :  { %v504_v15 = vadd.f32 %v488_v40, %v404_v14  ;;  %v392_v40 = vmul.f32 %v2738_v57, %v353_v9 }
  0xf0   :  { %2134 = vmatprep.subr.bf16.mxu1 %v2133_v22 }
  0xf1   :  { %v520_v6 = vmul.f32 0.01, %v504_v15  ;;  %v126_v16 = vpop.permute.xlu1 %125  ;;  %2136 = vmatpush3.bf16.msra.mxu1 %v2133_v22 }
  0xf2   :  { %v183_v28 = vmul.f32 %v2716_v46, %v126_v16  ;;  %v365_v23 = vpop.permute.xlu0 %364 }
  0xf3   :  { %v536_v18 = vmax.f32 %v504_v15, %v520_v6 }
  0xf4   :  { %v205_v37 = vadd.f32 %v2734_v54, %v183_v28 }
  0xf5   :  { %2064 = vmatmul.mubr.msk.f32.gmra.mrb[4].mxu0 %vm558_vm0, %v536_v18 }
  0xf6   :  { %v241_v10 = vpop.permute.xlu1 %240 }
  0xf7   :  { %v289_v34 = vmul.f32 %v2729_v53, %v241_v10 }
  0xf9   :  { %v305_v47 = vadd.f32 %v289_v34, %v205_v37  ;;  %v457_v34 = vpop.permute.xlu0 %456 }
  0xfa   :  { %v245_v27 = vpop.permute.xlu1 %244 }
  0xfb   :  { %v290_v30 = vmul.f32 %v2729_v53, %v245_v27  ;;  %v405_v55 = vadd.f32 %v389_v32, %v305_v47  ;;  %v187_v27 = vmul.f32 %v2716_v46, %v2790_v17 }
  0xfd   :  { %v306_v42 = vadd.f32 %v290_v30, %v206_v29  ;;  %v209_v29 = vadd.f32 %v2734_v54, %v187_v27 }
  0xff   :  { %v345_v39 = vpop.permute.xlu1 %344 }
 0x100   :  { %v390_v45 = vmul.f32 %v2738_v57, %v345_v39 }
 0x102   :  { %v406_v50 = vadd.f32 %v390_v45, %v306_v42  ;;  %v493_v42 = vmul.f32 %v2742_v60, %v457_v34 }
 0x104   :  { %v506_v51 = vadd.f32 %v490_v31, %v406_v50  ;;  %v441_v52 = vpop.permute.xlu1 %440  ;;  %v294_v50 = vmul.f32 %v2729_v53, %v2723_v49  ;;  %v790_v49 = vld [vmem:[%s3355_s5 + $0x30] sm:$0xff] }
 0x105   :  { %v489_v56 = vmul.f32 %v2742_v60, %v441_v52  ;;  %v788_v52 = vld [vmem:[%s3355_s5 + $0x20] sm:$0xff] }
 0x106   :  { %v522_v59 = vmul.f32 0.01, %v506_v51 }
 0x107   :  { %v505_v58 = vadd.f32 %v489_v56, %v405_v55  ;;  %v789_v55 = vld [vmem:[%s3355_s5 + $0x28] sm:$0xff] }
 0x108   :  { %v538_v63 = vmax.f32 %v506_v51, %v522_v59 }
 0x109   :  { %v521_v2 = vmul.f32 0.01, %v505_v58  ;;  %v136_v61 = vpop.permute.xlu1 %135 }
 0x10a   :  { %v185_v3 = vmul.f32 %v2716_v46, %v136_v61 }
 0x10b   :  { %v537_v62 = vmax.f32 %v505_v58, %v521_v2  ;;  %v2137_v58 = vpack.c.bf16 %v789_v55, %v788_v52 }
 0x10c   :  { %v207_v1 = vadd.f32 %v2734_v54, %v185_v3 }
 0x10d   :  { %2066 = vmatprep.mubr.msk.f32.mxu0 %vm558_vm0, %v537_v62  ;;  %v141_v35 = vpop.permute.xlu1 %140  ;;  %2138 = vmatprep.subr.bf16.mxu1 %v2137_v58 }
 0x10e   :  { %2067 = vmatmul.mubr.msk.f32.gmra.mrb[6].mxu0 %vm558_vm0, %v538_v63  ;;  %v186_v5 = vmul.f32 %v2716_v46, %v141_v35  ;;  %v307_v12 = vadd.f32 %v291_v4, %v207_v1  ;;  %2140 = vmatpush3.bf16.msra.mxu1 %v2137_v58  ;;  %v791_v35 = vld [vmem:[%s3355_s5 + $0x38] sm:$0xff] }
 0x110   :  { %v208_v11 = vadd.f32 %v2734_v54, %v186_v5 }
 0x112   :  { %v253_v0 = vpop.permute.xlu1 %252 }
 0x113   :  { %v292_v33 = vmul.f32 %v2729_v53, %v253_v0  ;;  %v2141_v0 = vpack.c.bf16 %v791_v35, %v790_v49 }
 0x115   :  { %v308_v14 = vadd.f32 %v292_v33, %v208_v11  ;;  %2142 = vmatprep.subr.bf16.mxu1 %v2141_v0  ;;  %v190_v33 = vmul.f32 %v2716_v46, %v2806_v24  ;;  %v395_v24 = vmul.f32 %v2738_v57, %v365_v23 }
 0x116   :  { %2144 = vmatpush3.bf16.msra.mxu1 %v2141_v0 }
 0x117   :  { %v349_v7 = vpop.permute.xlu1 %348  ;;  %v408_v18 = vadd.f32 %v392_v40, %v308_v14  ;;  %v212_v14 = vadd.f32 %v2734_v54, %v190_v33 }
 0x118   :  { %v391_v8 = vmul.f32 %v2738_v57, %v349_v7 }
 0x11a   :  { %v407_v15 = vadd.f32 %v391_v8, %v307_v12 }
 0x11c   :  { %v449_v13 = vpop.permute.xlu1 %448 }
 0x11d   :  { %v491_v44 = vmul.f32 %v2742_v60, %v449_v13  ;;  %v469_v13 = vpop.permute.xlu0 %468 }
 0x11f   :  { %v507_v6 = vadd.f32 %v491_v44, %v407_v15 }
 0x120   :  { %v453_v16 = vpop.permute.xlu1 %452 }
 0x121   :  { %v523_v25 = vmul.f32 0.01, %v507_v6  ;;  %v492_v19 = vmul.f32 %v2742_v60, %v453_v16  ;;  %v496_v16 = vmul.f32 %v2742_v60, %v469_v13 }
 0x123   :  { %v539_v26 = vmax.f32 %v507_v6, %v523_v25  ;;  %v508_v10 = vadd.f32 %v492_v19, %v408_v18 }
 0x125   :  { %v524_v20 = vmul.f32 0.01, %v508_v10  ;;  %2069 = vmatprep.mubr.msk.f32.mxu0 %vm558_vm0, %v539_v26  ;;  %v151_v21 = vpop.permute.xlu1 %150 }
 0x126   :  { %v188_v36 = vmul.f32 %v2716_v46, %v151_v21 }
 0x127   :  { %v540_v22 = vmax.f32 %v508_v10, %v524_v20 }
 0x128   :  { %v210_v47 = vadd.f32 %v2734_v54, %v188_v36 }
 0x129   :  { %2070 = vmatmul.mubr.msk.f32.gmra.mrb[8].mxu0 %vm558_vm0, %v540_v22 }
 0x12a   :  { %v257_v28 = vpop.permute.xlu1 %256  ;;  %v310_v59 = vadd.f32 %v294_v50, %v210_v47 }
 0x12b   :  { %v293_v30 = vmul.f32 %v2729_v53, %v257_v28 }
 0x12d   :  { %v309_v39 = vadd.f32 %v293_v30, %v209_v29 }
 0x12f   :  { %v357_v37 = vpop.permute.xlu1 %356 }
 0x130   :  { %v393_v31 = vmul.f32 %v2738_v57, %v357_v37  ;;  %v273_v37 = vpop.permute.xlu0 %272 }
 0x132   :  { %v409_v45 = vadd.f32 %v393_v31, %v309_v39  ;;  %v297_v31 = vmul.f32 %v2729_v53, %v273_v37  ;;  %v1034_v37 = vld [vmem:[#allocation3 + $0x48] sm:$0xff] }
 0x133   :  { %v361_v17 = vpop.permute.xlu1 %360 }
 0x134   :  { %v509_v32 = vadd.f32 %v493_v42, %v409_v45  ;;  %v394_v51 = vmul.f32 %v2738_v57, %v361_v17 }
 0x136   :  { %v525_v56 = vmul.f32 0.01, %v509_v32  ;;  %v410_v62 = vadd.f32 %v394_v51, %v310_v59 }
 0x138   :  { %v541_v2 = vmax.f32 %v509_v32, %v525_v56  ;;  %v461_v61 = vpop.permute.xlu1 %460  ;;  %v377_v32 = vpop.permute.xlu0 %376 }
 0x139   :  { %v494_v63 = vmul.f32 %v2742_v60, %v461_v61  ;;  %v398_v56 = vmul.f32 %v2738_v57, %v377_v32  ;;  %v1040_v32 = vld [vmem:[#allocation3 + $0x78] sm:$0xff] }
 0x13a   :  { %2072 = vmatprep.mubr.msk.f32.mxu0 %vm558_vm0, %v541_v2 }
 0x13b   :  { %v510_v3 = vadd.f32 %v494_v63, %v410_v62 }
 0x13d   :  { %v526_v4 = vmul.f32 0.01, %v510_v3  ;;  %v156_v1 = vpop.permute.xlu1 %155 }
 0x13e   :  { %v189_v9 = vmul.f32 %v2716_v46, %v156_v1 }
 0x13f   :  { %v542_v5 = vmax.f32 %v510_v3, %v526_v4 }
 0x140   :  { %v211_v40 = vadd.f32 %v2734_v54, %v189_v9 }
 0x141   :  { %2073 = vmatmul.mubr.msk.f32.gmra.mrb[10].mxu0 %vm558_vm0, %v542_v5 }
 0x142   :  { %v265_v7 = vpop.permute.xlu1 %264 }
 0x143   :  { %v295_v12 = vmul.f32 %v2729_v53, %v265_v7 }
 0x145   :  { %v311_v18 = vadd.f32 %v295_v12, %v211_v40 }
 0x146   :  { %v269_v8 = vpop.permute.xlu1 %268 }
 0x147   :  { %v296_v11 = vmul.f32 %v2729_v53, %v269_v8  ;;  %v411_v10 = vadd.f32 %v395_v24, %v311_v18 }
 0x149   :  { %v312_v44 = vadd.f32 %v296_v11, %v212_v14 }
 0x14b   :  { %v369_v15 = vpop.permute.xlu1 %368 }
 0x14c   :  { %v396_v6 = vmul.f32 %v2738_v57, %v369_v15 }
 0x14e   :  { %v412_v25 = vadd.f32 %v396_v6, %v312_v44 }
 0x150   :  { %v512_v19 = vadd.f32 %v496_v16, %v412_v25  ;;  %v465_v26 = vpop.permute.xlu1 %464 }
 0x151   :  { %v495_v20 = vmul.f32 %v2742_v60, %v465_v26 }
 0x152   :  { %v528_v22 = vmul.f32 0.01, %v512_v19 }
 0x153   :  { %v511_v21 = vadd.f32 %v495_v20, %v411_v10  ;;  %v1026_v10 = vld [vmem:[#allocation3 + $0x8] sm:$0xff]  ;;  %v1028_v20 = vld [vmem:[#allocation3 + $0x18] sm:$0xff] }
 0x154   :  { %v544_v30 = vmax.f32 %v512_v19, %v528_v22  ;;  %v2145_v22 = vpack.c.bf16 %v1028_v20, %v1026_v10  ;;  %v1054_v10 = vld [vmem:[#allocation3 + $0xe8] sm:$0xff]  ;;  %v1056_v20 = vld [vmem:[#allocation3 + $0xf8] sm:$0xff] }
 0x155   :  { %v527_v27 = vmul.f32 0.01, %v511_v21  ;;  %v166_v28 = vpop.permute.xlu1 %165 }
 0x156   :  { %v191_v23 = vmul.f32 %v2716_v46, %v166_v28  ;;  %v1030_v28 = vld [vmem:[#allocation3 + $0x28] sm:$0xff]  ;;  %2146 = vmatprep.subr.bf16.mxu0 %v2145_v22 }
 0x157   :  { %v543_v29 = vmax.f32 %v511_v21, %v527_v27  ;;  %v1025_v21 = vld [vmem:[#allocation3] sm:$0xff]  ;;  %v1027_v27 = vld [vmem:[#allocation3 + $0x10] sm:$0xff] }
 0x158   :  { %v213_v39 = vadd.f32 %v2734_v54, %v191_v23  ;;  %v1031_v23 = vld [vmem:[#allocation3 + $0x30] sm:$0xff] }
 0x159   :  { %2075 = vmatprep.mubr.msk.f32.mxu0 %vm558_vm0, %v543_v29  ;;  %v171_v34 = vpop.permute.xlu1 %170  ;;  %v1032_v29 = vld [vmem:[#allocation3 + $0x38] sm:$0xff] }
 0x15a   :  { %2076 = vmatmul.mubr.msk.f32.gmra.mrb[12].mxu0 %vm558_vm0, %v544_v30  ;;  %v192_v42 = vmul.f32 %v2716_v46, %v171_v34  ;;  %v313_v50 = vadd.f32 %v297_v31, %v213_v39  ;;  %v2147_v30 = vpack.c.bf16 %v1027_v27, %v1025_v21  ;;  %v2149_v34 = vpack.c.bf16 %v1032_v29, %v1030_v28  ;;  %v1036_v39 = vld [vmem:[#allocation3 + $0x58] sm:$0xff]  ;;  %v1053_v28 = vld [vmem:[#allocation3 + $0xe0] sm:$0xff]  ;;  %v1055_v29 = vld [vmem:[#allocation3 + $0xf0] sm:$0xff] }
 0x15b   :  { %v2173_v27 = vpack.c.bf16 %v1056_v20, %v1054_v10  ;;  %v1299_v10 = vld [vmem:[#allocation6 + $0x28] sm:$0xff]  ;;  %v1301_v20 = vld [vmem:[#allocation6 + $0x38] sm:$0xff] }
 0x15c   :  { %v214_v51 = vadd.f32 %v2734_v54, %v192_v42  ;;  %v2887_v54 = vld [vmem:[%s3354_s4] ss:$0 sm:$0xff]  ;;  %2148 = vmatpush1.bf16.msra.mxu0 %v2147_v30  ;;  %v2153_v42 = vpack.c.bf16 %v1036_v39, %v1034_v37  ;;  %v2467_v39 = vmov 0.0  }
 0x15d   :  { %2150 = vmatprep.subr.bf16.mxu0 %v2149_v34  ;;  %v2175_v34 = vpack.c.bf16 %v1055_v29, %v1053_v28  ;;  %v1300_v28 = vld [vmem:[#allocation6 + $0x30] sm:$0xff]  ;;  %v1303_v29 = vld [vmem:[#allocation6 + $0x48] sm:$0xff] }
 0x15e   :  { %v277_v36 = vpop.permute.xlu1 %276 }
 0x15f   :  { %v298_v47 = vmul.f32 %v2729_v53, %v277_v36  ;;  %v1029_v36 = vld [vmem:[#allocation3 + $0x20] sm:$0xff] }
 0x160   :  { %v2151_v31 = vpack.c.bf16 %v1031_v23, %v1029_v36 }
 0x161   :  { %v314_v55 = vadd.f32 %v298_v47, %v214_v51  ;;  %v1035_v47 = vld [vmem:[#allocation3 + $0x50] sm:$0xff] }
 0x162   :  { %2152 = vmatpush1.bf16.msra.mxu0 %v2151_v31 }
 0x163   :  { %v373_v45 = vpop.permute.xlu1 %372  ;;  %v414_v62 = vadd.f32 %v398_v56, %v314_v55  ;;  %2154 = vmatprep.subr.bf16.mxu0 %v2153_v42  ;;  %v1039_v55 = vld [vmem:[#allocation3 + $0x70] sm:$0xff]  ;;  %v1042_v56 = vld [vmem:[#allocation3 + $0x88] sm:$0xff] }
 0x164   :  { %v397_v17 = vmul.f32 %v2738_v57, %v373_v45  ;;  %v1033_v45 = vld [vmem:[#allocation3 + $0x40] sm:$0xff] }
 0x166   :  { %v413_v58 = vadd.f32 %v397_v17, %v313_v50  ;;  %v1038_v17 = vld [vmem:[#allocation3 + $0x68] sm:$0xff]  ;;  %v2155_v50 = vpack.c.bf16 %v1035_v47, %v1033_v45 }
 0x167   :  { %v2157_v51 = vpack.c.bf16 %v1040_v32, %v1038_v17 }
 0x168   :  { %v473_v52 = vpop.permute.xlu1 %472  ;;  %2156 = vmatpush1.bf16.msra.mxu0 %v2155_v50 }
 0x169   :  { %v497_v59 = vmul.f32 %v2742_v60, %v473_v52  ;;  %v1037_v52 = vld [vmem:[#allocation3 + $0x60] sm:$0xff]  ;;  %2158 = vmatprep.subr.bf16.mxu0 %v2157_v51 }
 0x16b   :  { %v513_v2 = vadd.f32 %v497_v59, %v413_v58  ;;  %v1044_v58 = vld [vmem:[#allocation3 + $0x98] sm:$0xff]  ;;  %v2159_v59 = vpack.c.bf16 %v1039_v55, %v1037_v52 }
 0x16c   :  { %v477_v61 = vpop.permute.xlu1 %476 }
 0x16d   :  { %v529_v46 = vmul.f32 0.01, %v513_v2  ;;  %v498_v63 = vmul.f32 %v2742_v60, %v477_v61  ;;  %v1041_v61 = vld [vmem:[#allocation3 + $0x80] sm:$0xff]  ;;  %2160 = vmatpush1.bf16.msra.mxu0 %v2159_v59 }
 0x16f   :  { %v545_v53 = vmax.f32 %v513_v2, %v529_v46  ;;  %v514_v49 = vadd.f32 %v498_v63, %v414_v62  ;;  %v2161_v2 = vpack.c.bf16 %v1044_v58, %v1042_v56  ;;  %v1043_v62 = vld [vmem:[#allocation3 + $0x90] sm:$0xff]  ;;  %v1046_v46 = vld [vmem:[#allocation3 + $0xa8] sm:$0xff]  ;;  %v1048_v63 = vld [vmem:[#allocation3 + $0xb8] sm:$0xff] }
 0x171   :  { %v530_v35 = vmul.f32 0.01, %v514_v49  ;;  %2078 = vmatprep.mubr.msk.f32.mxu0 %vm558_vm0, %v545_v53  ;;  %2162 = vmatprep.subr.bf16.mxu0 %v2161_v2 }
 0x173   :  { %v546_v0 = vmax.f32 %v514_v49, %v530_v35  ;;  %v2163_v49 = vpack.c.bf16 %v1043_v62, %v1041_v61 }
 0x175   :  { %2079 = vmatmul.mubr.msk.f32.gmra.mrb[14].mxu0 %vm558_vm0, %v546_v0 }
 0x176   :  { %2164 = vmatpush1.bf16.msra.mxu0 %v2163_v49  ;;  %1133 = vmatprep.mubr.f32.mxu0 %v2467_v39 }
 0x1b7   :  { %v2059_v57 = vpop.f32.mrb[0].mxu0 }
 0x1b8   :  { %v679_v3 = vadd.f32 %v2059_v57, %v2887_v54  ;;  %v673_v4 = vpop.f32.mrb[1].mxu0  ;;  %v2165_v57 = vpack.c.bf16 %v1048_v63, %v1046_v46  ;;  %v2925_v63 = vld [vmem:[%s3356_s6] ss:$0 sm:$0xff] }
 0x1b9   :  { %v674_v1 = vadd.f32 %v2887_v54, %v673_v4  ;;  %v1047_v4 = vld [vmem:[#allocation3 + $0xb0] sm:$0xff] }
 0x1ba   :  { %v753_v60 = vmul.f32 0.01, %v679_v3  ;;  %2166 = vmatprep.subr.bf16.mxu0 %v2165_v57 }
 0x1bb   :  { %v752_v5 = vmul.f32 0.01, %v674_v1  ;;  %v2062_v7 = vpop.f32.mrb[2].mxu0 }
 0x1bc   :  { %v689_v33 = vadd.f32 %v2062_v7, %v2887_v54  ;;  %v683_v8 = vpop.f32.mrb[3].mxu0  ;;  %v769_v12 = vmax.f32 %v679_v3, %v753_v60  ;;  %v1045_v3 = vld [vmem:[#allocation3 + $0xa0] sm:$0xff] }
 0x1bd   :  { %v684_v9 = vadd.f32 %v2887_v54, %v683_v8  ;;  %v768_v11 = vmax.f32 %v674_v1, %v752_v5  ;;  %v2167_v7 = vpack.c.bf16 %v1047_v4, %v1045_v3 }
 0x1be   :  { %v755_v13 = vmul.f32 0.01, %v689_v33 }
 0x1bf   :  { %v754_v14 = vmul.f32 0.01, %v684_v9  ;;  %2097 = vmatprep.mubr.msk.f32.mxu1 %vm799_vm1, %v768_v11  ;;  %2168 = vmatpush1.bf16.msra.mxu0 %v2167_v7 }
 0x1c0   :  { %2098 = vmatmul.mubr.msk.f32.vlgmr.msra.gmra.mrb[0].mxu1 %vm799_vm1, %v769_v12  ;;  %v771_v15 = vmax.f32 %v689_v33, %v755_v13 }
 0x1c1   :  { %v770_v40 = vmax.f32 %v684_v9, %v754_v14 }
 0x1c3   :  { %2100 = vmatprep.mubr.msk.f32.mxu1 %vm799_vm1, %v770_v40 }
 0x1c4   :  { %2101 = vmatmul.mubr.msk.f32.gmra.mrb[2].mxu1 %vm799_vm1, %v771_v15 }
 0x1c8   :  { %v2065_v44 = vpop.f32.mrb[4].mxu0 }
 0x1c9   :  { %v699_v6 = vadd.f32 %v2065_v44, %v2887_v54  ;;  %v693_v16 = vpop.f32.mrb[5].mxu0 }
 0x1ca   :  { %v694_v24 = vadd.f32 %v2887_v54, %v693_v16  ;;  %v1052_v16 = vld [vmem:[#allocation3 + $0xd8] sm:$0xff] }
 0x1cb   :  { %v757_v18 = vmul.f32 0.01, %v699_v6 }
 0x1cc   :  { %v756_v25 = vmul.f32 0.01, %v694_v24 }
 0x1cd   :  { %v773_v26 = vmax.f32 %v699_v6, %v757_v18  ;;  %v1050_v6 = vld [vmem:[#allocation3 + $0xc8] sm:$0xff]  ;;  %v1049_v18 = vld [vmem:[#allocation3 + $0xc0] sm:$0xff] }
 0x1ce   :  { %v772_v19 = vmax.f32 %v694_v24, %v756_v25  ;;  %v2169_v24 = vpack.c.bf16 %v1052_v16, %v1050_v6  ;;  %v1051_v25 = vld [vmem:[#allocation3 + $0xd0] sm:$0xff] }
 0x1d0   :  { %2103 = vmatprep.mubr.msk.f32.mxu1 %vm799_vm1, %v772_v19  ;;  %v2171_v19 = vpack.c.bf16 %v1051_v25, %v1049_v18  ;;  %2170 = vmatprep.subr.bf16.mxu0 %v2169_v24  ;;  %v1295_v24 = vld [vmem:[#allocation6 + $0x8] sm:$0xff]  ;;  %v1297_v18 = vld [vmem:[#allocation6 + $0x18] sm:$0xff]  ;;  %v1294_v25 = vld [vmem:[#allocation6] sm:$0xff] }
 0x1d1   :  { %2104 = vmatmul.mubr.msk.f32.gmra.mrb[4].mxu1 %vm799_vm1, %v773_v26 }
 0x1d2   :  { %2172 = vmatpush1.bf16.msra.mxu0 %v2171_v19  ;;  %v2177_v19 = vpack.c.bf16 %v1297_v18, %v1295_v24  ;;  %v1326_v18 = vld [vmem:[#allocation6 + $0x100] sm:$0xff] }
 0x1d3   :  { %2174 = vmatprep.subr.bf16.mxu0 %v2173_v27  ;;  %v1298_v27 = vld [vmem:[#allocation6 + $0x20] sm:$0xff] }
 0x1d4   :  { %2241 = vmatprep.subr.bf16.mxu1 %v2177_v19 }
 0x1d6   :  { %2176 = vmatpush1.bf16.msra.mxu0 %v2175_v34  ;;  %v2183_v34 = vpack.c.bf16 %v1300_v28, %v1298_v27  ;;  %v1335_v27 = vld [vmem:[#allocation6 + $0x148] sm:$0xff]  ;;  %v1337_v28 = vld [vmem:[#allocation6 + $0x158] sm:$0xff] }
 0x1d7   :  { %2178 = vmatprep.subr.bf16.mxu0 %v2177_v19  ;;  %v1331_v19 = vld [vmem:[#allocation6 + $0x128] sm:$0xff] }
 0x1e1   :  { %v2068_v53 = vpop.f32.mrb[6].mxu0 }
 0x1e2   :  { %v709_v35 = vadd.f32 %v2068_v53, %v2887_v54  ;;  %v703_v0 = vpop.f32.mrb[7].mxu0 }
 0x1e3   :  { %v704_v1 = vadd.f32 %v2887_v54, %v703_v0 }
 0x1e4   :  { %v759_v60 = vmul.f32 0.01, %v709_v35 }
 0x1e5   :  { %v758_v5 = vmul.f32 0.01, %v704_v1 }
 0x1e6   :  { %v775_v8 = vmax.f32 %v709_v35, %v759_v60 }
 0x1e7   :  { %v774_v33 = vmax.f32 %v704_v1, %v758_v5 }
 0x1e9   :  { %2106 = vmatprep.mubr.msk.f32.mxu1 %vm799_vm1, %v774_v33 }
 0x1ea   :  { %2107 = vmatmul.mubr.msk.f32.gmra.mrb[6].mxu1 %vm799_vm1, %v775_v8 }
 0x1fc   :  { %v2071_v9 = vpop.f32.mrb[8].mxu0 }
 0x1fd   :  { %v719_v11 = vadd.f32 %v2071_v9, %v2887_v54  ;;  %v713_v12 = vpop.f32.mrb[9].mxu0 }
 0x1fe   :  { %v714_v13 = vadd.f32 %v2887_v54, %v713_v12 }
 0x1ff   :  { %v761_v14 = vmul.f32 0.01, %v719_v11 }
 0x200   :  { %v760_v40 = vmul.f32 0.01, %v714_v13 }
 0x201   :  { %v777_v44 = vmax.f32 %v719_v11, %v761_v14 }
 0x202   :  { %v776_v15 = vmax.f32 %v714_v13, %v760_v40 }
 0x204   :  { %2109 = vmatprep.mubr.msk.f32.mxu1 %vm799_vm1, %v776_v15 }
 0x205   :  { %2110 = vmatmul.mubr.msk.f32.gmra.mrb[8].mxu1 %vm799_vm1, %v777_v44 }
 0x214   :  { %v2074_v26 = vpop.f32.mrb[10].mxu0 }
 0x215   :  { %v729_v21 = vadd.f32 %v2074_v26, %v2887_v54  ;;  %v723_v22 = vpop.f32.mrb[11].mxu0  ;;  %v1296_v26 = vld [vmem:[#allocation6 + $0x10] sm:$0xff] }
 0x216   :  { %v724_v30 = vadd.f32 %v2887_v54, %v723_v22  ;;  %v2181_v22 = vpack.c.bf16 %v1301_v20, %v1299_v10 }
 0x217   :  { %v763_v36 = vmul.f32 0.01, %v729_v21 }
 0x218   :  { %v762_v23 = vmul.f32 0.01, %v724_v30 }
 0x219   :  { %v779_v31 = vmax.f32 %v729_v21, %v763_v36  ;;  %v2179_v21 = vpack.c.bf16 %v1296_v26, %v1294_v25  ;;  %v1328_v25 = vld [vmem:[#allocation6 + $0x110] sm:$0xff]  ;;  %v1333_v26 = vld [vmem:[#allocation6 + $0x138] sm:$0xff] }
 0x21a   :  { %v778_v37 = vmax.f32 %v724_v30, %v762_v23  ;;  %v1305_v30 = vld [vmem:[#allocation6 + $0x58] sm:$0xff]  ;;  %v1302_v23 = vld [vmem:[#allocation6 + $0x40] sm:$0xff]  ;;  %v2211_v10 = vpack.c.bf16 %v1328_v25, %v1326_v18  ;;  %v2213_v20 = vpack.c.bf16 %v1333_v26, %v1331_v19 }
 0x21b   :  { %2257 = vmatpush1.bf16.msra.mxu1 %v2179_v21  ;;  %v2185_v36 = vpack.c.bf16 %v1305_v30, %v1303_v29  ;;  %v2217_v30 = vpack.c.bf16 %v1337_v28, %v1335_v27 }
 0x21c   :  { %2112 = vmatprep.mubr.msk.f32.mxu1 %vm799_vm1, %v778_v37  ;;  %v1304_v37 = vld [vmem:[#allocation6 + $0x50] sm:$0xff]  ;;  %2242 = vmatprep.subr.bf16.mxu1 %v2181_v22 }
 0x21d   :  { %2113 = vmatmul.mubr.msk.f32.gmra.mrb[10].mxu1 %vm799_vm1, %v779_v31  ;;  %v1307_v31 = vld [vmem:[#allocation6 + $0x68] sm:$0xff] }
 0x21f   :  { %2258 = vmatpush1.bf16.msra.mxu1 %v2183_v34 }
 0x220   :  { %2243 = vmatprep.subr.bf16.mxu1 %v2185_v36 }
 0x22d   :  { %v2077_v42 = vpop.f32.mrb[12].mxu0 }
 0x22e   :  { %v739_v45 = vadd.f32 %v2077_v42, %v2887_v54  ;;  %v733_v47 = vpop.f32.mrb[13].mxu0  ;;  %v1309_v42 = vld [vmem:[#allocation6 + $0x78] sm:$0xff] }
 0x22f   :  { %v734_v17 = vadd.f32 %v2887_v54, %v733_v47  ;;  %v2189_v47 = vpack.c.bf16 %v1309_v42, %v1307_v31 }
 0x230   :  { %v765_v32 = vmul.f32 0.01, %v739_v45 }
 0x231   :  { %v764_v50 = vmul.f32 0.01, %v734_v17 }
 0x232   :  { %v781_v52 = vmax.f32 %v739_v45, %v765_v32  ;;  %v2187_v45 = vpack.c.bf16 %v1304_v37, %v1302_v23  ;;  %v1308_v32 = vld [vmem:[#allocation6 + $0x70] sm:$0xff]  ;;  %v1339_v23 = vld [vmem:[#allocation6 + $0x168] sm:$0xff]  ;;  %v1341_v37 = vld [vmem:[#allocation6 + $0x178] sm:$0xff] }
 0x233   :  { %v780_v51 = vmax.f32 %v734_v17, %v764_v50  ;;  %v1306_v17 = vld [vmem:[#allocation6 + $0x60] sm:$0xff]  ;;  %v1311_v50 = vld [vmem:[#allocation6 + $0x88] sm:$0xff] }
 0x234   :  { %2259 = vmatpush1.bf16.msra.mxu1 %v2187_v45 }
 0x235   :  { %2115 = vmatprep.mubr.msk.f32.mxu1 %vm799_vm1, %v780_v51  ;;  %v1313_v51 = vld [vmem:[#allocation6 + $0x98] sm:$0xff]  ;;  %2244 = vmatprep.subr.bf16.mxu1 %v2189_v47 }
 0x236   :  { %2116 = vmatmul.mubr.msk.f32.gmra.mrb[12].mxu1 %vm799_vm1, %v781_v52  ;;  %v2191_v52 = vpack.c.bf16 %v1308_v32, %v1306_v17 }
 0x238   :  { %2260 = vmatpush1.bf16.msra.mxu1 %v2191_v52 }
 0x248   :  { %v2080_v55 = vpop.f32.mrb[14].mxu0 }
 0x249   :  { %v749_v56 = vadd.f32 %v2080_v55, %v2887_v54  ;;  %v743_v58 = vpop.f32.mrb[15].mxu0 }
 0x24a   :  { %v744_v59 = vadd.f32 %v2887_v54, %v743_v58  ;;  %v1310_v58 = vld [vmem:[#allocation6 + $0x80] sm:$0xff] }
 0x24b   :  { %v767_v2 = vmul.f32 0.01, %v749_v56 }
 0x24c   :  { %v766_v61 = vmul.f32 0.01, %v744_v59 }
 0x24d   :  { %v783_v46 = vmax.f32 %v749_v56, %v767_v2  ;;  %v2193_v56 = vpack.c.bf16 %v1313_v51, %v1311_v50  ;;  %v1338_v50 = vld [vmem:[#allocation6 + $0x160] sm:$0xff]  ;;  %v1340_v51 = vld [vmem:[#allocation6 + $0x170] sm:$0xff] }
 0x24e   :  { %v782_v62 = vmax.f32 %v744_v59, %v766_v61  ;;  %v1312_v59 = vld [vmem:[#allocation6 + $0x90] sm:$0xff]  ;;  %v1315_v61 = vld [vmem:[#allocation6 + $0xa8] sm:$0xff] }
 0x24f   :  { %2245 = vmatprep.subr.bf16.mxu1 %v2193_v56 }
 0x250   :  { %2118 = vmatprep.mubr.msk.f32.mxu1 %vm799_vm1, %v782_v62  ;;  %v1317_v62 = vld [vmem:[#allocation6 + $0xb8] sm:$0xff] }
 0x251   :  { %2119 = vmatmul.mubr.msk.f32.gmra.mrb[14].mxu1 %vm799_vm1, %v783_v46  ;;  %vm1901_vm1 = vcmask 589312  }
 0x293   :  { %v2099_v53 = vpop.f32.mrb[0].mxu1 }
 0x294   :  { %v914_v49 = vpop.f32.mrb[1].mxu1  ;;  %v920_v35 = vadd.f32 %v2099_v53, %v2925_v63 }
 0x295   :  { %v915_v0 = vadd.f32 %v2925_v63, %v914_v49  ;;  %v2195_v49 = vpack.c.bf16 %v1312_v59, %v1310_v58  ;;  %v2223_v58 = vpack.c.bf16 %v1340_v51, %v1338_v50 }
 0x296   :  { %v994_v4 = vmul.f32 0.01, %v920_v35 }
 0x297   :  { %v993_v54 = vmul.f32 0.01, %v915_v0  ;;  %v2102_v57 = vpop.f32.mrb[2].mxu1  ;;  %2261 = vmatpush1.bf16.msra.mxu1 %v2195_v49 }
 0x298   :  { %v924_v3 = vpop.f32.mrb[3].mxu1  ;;  %v1010_v5 = vmax.f32 %v920_v35, %v994_v4  ;;  %v930_v7 = vadd.f32 %v2102_v57, %v2925_v63  ;;  %v1316_v57 = vld [vmem:[#allocation6 + $0xb0] sm:$0xff]  ;;  %v1321_v4 = vld [vmem:[#allocation6 + $0xd8] sm:$0xff] }
 0x299   :  { %v1009_v1 = vmax.f32 %v915_v0, %v993_v54  ;;  %v925_v60 = vadd.f32 %v2925_v63, %v924_v3  ;;  %v2197_v0 = vpack.c.bf16 %v1317_v62, %v1315_v61  ;;  %v1314_v54 = vld [vmem:[#allocation6 + $0xa0] sm:$0xff]  ;;  %v1319_v3 = vld [vmem:[#allocation6 + $0xc8] sm:$0xff] }
 0x29a   :  { %v996_v8 = vmul.f32 0.01, %v930_v7  ;;  %v1342_v62 = vld [vmem:[#allocation6 + $0x180] sm:$0xff] }
 0x29b   :  { %1134 = vmatmul.mubr.f32.vlgmr.msra.gmra.mrb[16].mxu0 %v1009_v1  ;;  %v995_v33 = vmul.f32 0.01, %v925_v60  ;;  %2246 = vmatprep.subr.bf16.mxu1 %v2197_v0 }
 0x29c   :  { %1139 = vmatprep.mubr.f32.mxu0 %v2467_v39  ;;  %v1012_v12 = vmax.f32 %v930_v7, %v996_v8  ;;  %2180 = vmatpush1.bf16.msra.mxu0 %v2179_v21  ;;  %v2201_v7 = vpack.c.bf16 %v1321_v4, %v1319_v3  ;;  %v1320_v8 = vld [vmem:[#allocation6 + $0xd0] sm:$0xff]  ;;  %v1330_v21 = vld [vmem:[#allocation6 + $0x120] sm:$0xff] }
 0x29d   :  { %v1011_v9 = vmax.f32 %v925_v60, %v995_v33  ;;  %2182 = vmatprep.subr.bf16.mxu0 %v2181_v22  ;;  %v1318_v33 = vld [vmem:[#allocation6 + $0xc0] sm:$0xff]  ;;  %v1332_v22 = vld [vmem:[#allocation6 + $0x130] sm:$0xff] }
 0x29e   :  { %v2215_v29 = vpack.c.bf16 %v1332_v22, %v1330_v21  ;;  %v1348_v3 = vld [vmem:[#allocation6 + $0x1b0] sm:$0xff] }
 0x29f   :  { %1140 = vmatmul.mubr.f32.gmra.mrb[18].mxu0 %v1010_v5  ;;  %v2199_v5 = vpack.c.bf16 %v1316_v57, %v1314_v54  ;;  %v1346_v57 = vld [vmem:[#allocation6 + $0x1a0] sm:$0xff] }
 0x2a0   :  { %1145 = vmatprep.mubr.f32.mxu0 %v2467_v39  ;;  %2184 = vmatpush1.bf16.msra.mxu0 %v2183_v34  ;;  %v1334_v34 = vld [vmem:[#allocation6 + $0x140] sm:$0xff]  ;;  %v2231_v4 = vpack.c.bf16 %v1348_v3, %v1346_v57 }
 0x2a1   :  { %2186 = vmatprep.subr.bf16.mxu0 %v2185_v36  ;;  %2262 = vmatpush1.bf16.msra.mxu1 %v2199_v5  ;;  %v1336_v36 = vld [vmem:[#allocation6 + $0x150] sm:$0xff] }
 0x2a2   :  { %2247 = vmatprep.subr.bf16.mxu1 %v2201_v7  ;;  %v2219_v42 = vpack.c.bf16 %v1336_v36, %v1334_v34 }
 0x2a3   :  { %1146 = vmatmul.mubr.f32.gmra.mrb[20].mxu0 %v1011_v9  ;;  %v1323_v9 = vld [vmem:[#allocation6 + $0xe8] sm:$0xff] }
 0x2a4   :  { %v2105_v11 = vpop.f32.mrb[4].mxu1  ;;  %1151 = vmatprep.mubr.f32.mxu0 %v2467_v39  ;;  %2188 = vmatpush1.bf16.msra.mxu0 %v2187_v45 }
 0x2a5   :  { %v934_v13 = vpop.f32.mrb[5].mxu1  ;;  %v940_v14 = vadd.f32 %v2105_v11, %v2925_v63  ;;  %2190 = vmatprep.subr.bf16.mxu0 %v2189_v47  ;;  %v1325_v11 = vld [vmem:[#allocation6 + $0xf8] sm:$0xff]  ;;  %v2221_v47 = vpack.c.bf16 %v1341_v37, %v1339_v23 }
 0x2a6   :  { %v935_v40 = vadd.f32 %v2925_v63, %v934_v13  ;;  %v2203_v13 = vpack.c.bf16 %v1320_v8, %v1318_v33  ;;  %v1352_v33 = vld [vmem:[#allocation6 + $0x1d0] sm:$0xff] }
 0x2a7   :  { %1152 = vmatmul.mubr.f32.gmra.mrb[22].mxu0 %v1012_v12  ;;  %v998_v44 = vmul.f32 0.01, %v940_v14 }
 0x2a8   :  { %v997_v15 = vmul.f32 0.01, %v935_v40  ;;  %1157 = vmatprep.mubr.f32.mxu0 %v2467_v39  ;;  %2192 = vmatpush1.bf16.msra.mxu0 %v2191_v52  ;;  %v1343_v52 = vld [vmem:[#allocation6 + $0x188] sm:$0xff] }
 0x2a9   :  { %v1014_v16 = vmax.f32 %v940_v14, %v998_v44  ;;  %2194 = vmatprep.subr.bf16.mxu0 %v2193_v56  ;;  %v2205_v14 = vpack.c.bf16 %v1325_v11, %v1323_v9  ;;  %v1327_v44 = vld [vmem:[#allocation6 + $0x108] sm:$0xff]  ;;  %2263 = vmatpush1.bf16.msra.mxu1 %v2203_v13 }
 0x2aa   :  { %v1013_v6 = vmax.f32 %v935_v40, %v997_v15  ;;  %v1322_v40 = vld [vmem:[#allocation6 + $0xe0] sm:$0xff]  ;;  %v1324_v15 = vld [vmem:[#allocation6 + $0xf0] sm:$0xff]  ;;  %v1355_v11 = vld [vmem:[#allocation6 + $0x1e8] sm:$0xff] }
 0x2ab   :  { %2248 = vmatprep.subr.bf16.mxu1 %v2205_v14 }
 0x2ac   :  { %1158 = vmatmul.mubr.f32.gmra.mrb[24].mxu0 %v1013_v6  ;;  %v1329_v6 = vld [vmem:[#allocation6 + $0x118] sm:$0xff] }
 0x2ad   :  { %1163 = vmatprep.mubr.f32.mxu0 %v2467_v39  ;;  %2196 = vmatpush1.bf16.msra.mxu0 %v2195_v49  ;;  %v2209_v24 = vpack.c.bf16 %v1329_v6, %v1327_v44  ;;  %v1349_v49 = vld [vmem:[#allocation6 + $0x1b8] sm:$0xff] }
 0x2ae   :  { %2198 = vmatprep.subr.bf16.mxu0 %v2197_v0 }
 0x2b0   :  { %1164 = vmatmul.mubr.f32.gmra.mrb[26].mxu0 %v1014_v16  ;;  %v2207_v16 = vpack.c.bf16 %v1324_v15, %v1322_v40  ;;  %v1354_v40 = vld [vmem:[#allocation6 + $0x1e0] sm:$0xff]  ;;  %v1356_v15 = vld [vmem:[#allocation6 + $0x1f0] sm:$0xff] }
 0x2b1   :  { %1169 = vmatprep.mubr.f32.mxu0 %v2467_v39  ;;  %2200 = vmatpush1.bf16.msra.mxu0 %v2199_v5 }
 0x2b2   :  { %2202 = vmatprep.subr.bf16.mxu0 %v2201_v7  ;;  %2264 = vmatpush1.bf16.msra.mxu1 %v2207_v16  ;;  %v1350_v7 = vld [vmem:[#allocation6 + $0x1c0] sm:$0xff] }
 0x2b3   :  { %2249 = vmatprep.subr.bf16.mxu1 %v2209_v24  ;;  %v2235_v8 = vpack.c.bf16 %v1352_v33, %v1350_v7 }
 0x2b5   :  { %2204 = vmatpush1.bf16.msra.mxu0 %v2203_v13 }
 0x2b6   :  { %2206 = vmatprep.subr.bf16.mxu0 %v2205_v14  ;;  %2265 = vmatpush1.bf16.msra.mxu1 %v2211_v10 }
 0x2b7   :  { %2250 = vmatprep.subr.bf16.mxu1 %v2213_v20 }
 0x2b9   :  { %2208 = vmatpush1.bf16.msra.mxu0 %v2207_v16  ;;  %v2239_v16 = vpack.c.bf16 %v1356_v15, %v1354_v40 }
 0x2ba   :  { %2210 = vmatprep.subr.bf16.mxu0 %v2209_v24  ;;  %2266 = vmatpush1.bf16.msra.mxu1 %v2215_v29 }
 0x2bb   :  { %2251 = vmatprep.subr.bf16.mxu1 %v2217_v30 }
 0x2bd   :  { %v2108_v55 = vpop.f32.mrb[6].mxu1  ;;  %2212 = vmatpush1.bf16.msra.mxu0 %v2211_v10 }
 0x2be   :  { %v944_v2 = vpop.f32.mrb[7].mxu1  ;;  %v950_v46 = vadd.f32 %v2108_v55, %v2925_v63  ;;  %2214 = vmatprep.subr.bf16.mxu0 %v2213_v20  ;;  %v1345_v55 = vld [vmem:[#allocation6 + $0x198] sm:$0xff]  ;;  %2267 = vmatpush1.bf16.msra.mxu1 %v2219_v42 }
 0x2bf   :  { %v945_v53 = vadd.f32 %v2925_v63, %v944_v2  ;;  %2252 = vmatprep.subr.bf16.mxu1 %v2221_v47  ;;  %v2225_v61 = vpack.c.bf16 %v1345_v55, %v1343_v52 }
 0x2c0   :  { %v1000_v1 = vmul.f32 0.01, %v950_v46 }
 0x2c1   :  { %v999_v35 = vmul.f32 0.01, %v945_v53  ;;  %2216 = vmatpush1.bf16.msra.mxu0 %v2215_v29 }
 0x2c2   :  { %v1016_v12 = vmax.f32 %v950_v46, %v1000_v1  ;;  %2218 = vmatprep.subr.bf16.mxu0 %v2217_v30  ;;  %v1344_v46 = vld [vmem:[#allocation6 + $0x190] sm:$0xff]  ;;  %2268 = vmatpush1.bf16.msra.mxu1 %v2223_v58  ;;  %v1351_v1 = vld [vmem:[#allocation6 + $0x1c8] sm:$0xff] }
 0x2c3   :  { %v1015_v60 = vmax.f32 %v945_v53, %v999_v35  ;;  %v1347_v53 = vld [vmem:[#allocation6 + $0x1a8] sm:$0xff]  ;;  %v2227_v35 = vpack.c.bf16 %v1344_v46, %v1342_v62  ;;  %2253 = vmatprep.subr.bf16.mxu1 %v2225_v61 }
 0x2c4   :  { %v2229_v54 = vpack.c.bf16 %v1349_v49, %v1347_v53 }
 0x2c5   :  { %1170 = vmatmul.mubr.f32.gmra.mrb[28].mxu0 %v1015_v60  ;;  %v1353_v60 = vld [vmem:[#allocation6 + $0x1d8] sm:$0xff] }
 0x2c6   :  { %1175 = vmatprep.mubr.f32.mxu0 %v2467_v39  ;;  %2220 = vmatpush1.bf16.msra.mxu0 %v2219_v42  ;;  %v2233_v5 = vpack.c.bf16 %v1353_v60, %v1351_v1 }
 0x2c7   :  { %2222 = vmatprep.subr.bf16.mxu0 %v2221_v47  ;;  %2269 = vmatpush1.bf16.msra.mxu1 %v2227_v35  ;;  %v1057_v47 = vld [vmem:[%s3358_s8] sm:$0x3] }
 0x2c8   :  { %2254 = vmatprep.subr.bf16.mxu1 %v2229_v54 }
 0x2c9   :  { %1176 = vmatmul.mubr.f32.gmra.mrb[30].mxu0 %v1016_v12  ;;  %v1357_v12 = vld [vmem:[#allocation6 + $0x1f8] sm:$0xff] }
 0x2ca   :  { %1181 = vmatprep.mubr.f32.mxu0 %v2467_v39  ;;  %2224 = vmatpush1.bf16.msra.mxu0 %v2223_v58  ;;  %v2237_v14 = vpack.c.bf16 %v1357_v12, %v1355_v11 }
 0x2cb   :  { %2226 = vmatprep.subr.bf16.mxu0 %v2225_v61  ;;  %2270 = vmatpush1.bf16.msra.mxu1 %v2231_v4 }
 0x2cc   :  { %2255 = vmatprep.subr.bf16.mxu1 %v2233_v5 }
 0x2ce   :  { %2228 = vmatpush1.bf16.msra.mxu0 %v2227_v35 }
 0x2cf   :  { %2230 = vmatprep.subr.bf16.mxu0 %v2229_v54  ;;  %2271 = vmatpush1.bf16.msra.mxu1 %v2235_v8 }
 0x2d0   :  { %2256 = vmatprep.subr.bf16.mxu1 %v2237_v14 }
 0x2d2   :  { %2232 = vmatpush1.bf16.msra.mxu0 %v2231_v4 }
 0x2d3   :  { %2234 = vmatprep.subr.bf16.mxu0 %v2233_v5  ;;  %2272 = vmatpush1.bf16.msra.mxu1 %v2239_v16 }
 0x2d6   :  { %2236 = vmatpush1.bf16.msra.mxu0 %v2235_v8 }
 0x2d7   :  { %2238 = vmatprep.subr.bf16.mxu0 %v2237_v14 }
 0x2d8   :  { %v2111_v31 = vpop.f32.mrb[8].mxu1 }
 0x2d9   :  { %v954_v45 = vpop.f32.mrb[9].mxu1  ;;  %v960_v17 = vadd.f32 %v2111_v31, %v2925_v63 }
 0x2da   :  { %v955_v32 = vadd.f32 %v2925_v63, %v954_v45  ;;  %2240 = vmatpush1.bf16.msra.mxu0 %v2239_v16 }
 0x2db   :  { %v1002_v59 = vmul.f32 0.01, %v960_v17 }
 0x2dc   :  { %v1001_v56 = vmul.f32 0.01, %v955_v32 }
 0x2dd   :  { %v1018_v0 = vmax.f32 %v960_v17, %v1002_v59  ;;  %v2962_v17 = vrot.slane %v1057_v47, %v2707_v43 }
 0x2de   :  { %v1017_v2 = vmax.f32 %v955_v32, %v1001_v56  ;;  %v2965_v32 = vrot.slane %v1057_v47, %v2720_v48 }
 0x2e0   :  { %1182 = vmatmul.mubr.f32.gmra.mrb[32].mxu0 %v1017_v2 }
 0x2e1   :  { %1187 = vmatprep.mubr.f32.mxu0 %v2467_v39 }
 0x2e4   :  { %1188 = vmatmul.mubr.f32.gmra.mrb[34].mxu0 %v1018_v0 }
 0x2e5   :  { %1193 = vmatprep.mubr.f32.mxu0 %v2467_v39 }
 0x2f0   :  { %v2114_v9 = vpop.f32.mrb[10].mxu1 }
 0x2f1   :  { %v964_v13 = vpop.f32.mrb[11].mxu1  ;;  %v970_v44 = vadd.f32 %v2114_v9, %v2925_v63 }
 0x2f2   :  { %v965_v6 = vadd.f32 %v2925_v63, %v964_v13 }
 0x2f3   :  { %v1004_v18 = vmul.f32 0.01, %v970_v44 }
 0x2f4   :  { %v1003_v24 = vmul.f32 0.01, %v965_v6 }
 0x2f5   :  { %v1020_v19 = vmax.f32 %v970_v44, %v1004_v18 }
 0x2f6   :  { %v1019_v25 = vmax.f32 %v965_v6, %v1003_v24 }
 0x2f8   :  { %1194 = vmatmul.mubr.f32.gmra.mrb[36].mxu0 %v1019_v25 }
 0x2f9   :  { %1199 = vmatprep.mubr.f32.mxu0 %v2467_v39 }
 0x2fc   :  { %1200 = vmatmul.mubr.f32.gmra.mrb[38].mxu0 %v1020_v19 }
 0x2fd   :  { %1205 = vmatprep.mubr.f32.mxu0 %v2467_v39 }
 0x309   :  { %v2117_v26 = vpop.f32.mrb[12].mxu1 }
 0x30a   :  { %v974_v10 = vpop.f32.mrb[13].mxu1  ;;  %v980_v20 = vadd.f32 %v2117_v26, %v2925_v63 }
 0x30b   :  { %v975_v21 = vadd.f32 %v2925_v63, %v974_v10 }
 0x30c   :  { %v1006_v27 = vmul.f32 0.01, %v980_v20 }
 0x30d   :  { %v1005_v22 = vmul.f32 0.01, %v975_v21 }
 0x30e   :  { %v1022_v29 = vmax.f32 %v980_v20, %v1006_v27 }
 0x30f   :  { %v1021_v28 = vmax.f32 %v975_v21, %v1005_v22 }
 0x311   :  { %1206 = vmatmul.mubr.f32.gmra.mrb[40].mxu0 %v1021_v28 }
 0x312   :  { %1211 = vmatprep.mubr.f32.mxu0 %v2467_v39 }
 0x315   :  { %1212 = vmatmul.mubr.f32.gmra.mrb[42].mxu0 %v1022_v29 }
 0x316   :  { %1217 = vmatprep.mubr.f32.mxu0 %v2467_v39 }
 0x324   :  { %v2120_v30 = vpop.f32.mrb[14].mxu1 }
 0x325   :  { %v984_v34 = vpop.f32.mrb[15].mxu1  ;;  %v990_v36 = vadd.f32 %v2120_v30, %v2925_v63 }
 0x326   :  { %v985_v23 = vadd.f32 %v2925_v63, %v984_v34 }
 0x327   :  { %v1008_v31 = vmul.f32 0.01, %v990_v36 }
 0x328   :  { %v1007_v37 = vmul.f32 0.01, %v985_v23 }
 0x329   :  { %v1024_v45 = vmax.f32 %v990_v36, %v1008_v31 }
 0x32a   :  { %v1023_v42 = vmax.f32 %v985_v23, %v1007_v37 }
 0x32c   :  { %1218 = vmatmul.mubr.f32.gmra.mrb[44].mxu0 %v1023_v42 }
 0x32d   :  { %1223 = vmatprep.mubr.f32.mxu0 %v2467_v39 }
 0x330   :  { %1224 = vmatmul.mubr.f32.gmra.mrb[46].mxu0 %v1024_v45 }
 0x36e   :  { %v1135_v50 = vpop.f32.mrb[16].mxu0 }
 0x36f   :  { %v1136_v63 = vadd.f32 %v1135_v50, %v2962_v17  ;;  %v1137_v51 = vpop.f32.mrb[17].mxu0 }
 0x370   :  { %v1138_v52 = vadd.f32 %v1137_v51, %v2965_v32 }
 0x371   :  { %v1230_v55 = vmul.f32 0.01, %v1136_v63 }
 0x372   :  { %v1231_v39 = vmul.f32 0.01, %v1138_v52  ;;  %v1141_v56 = vpop.f32.mrb[18].mxu0 }
 0x373   :  { %v1142_v58 = vadd.f32 %v1141_v56, %v2962_v17  ;;  %v1143_v59 = vpop.f32.mrb[19].mxu0  ;;  %v1262_v62 = vmax.f32 %v1136_v63, %v1230_v55 }
 0x374   :  { %v1263_v2 = vmax.f32 %v1138_v52, %v1231_v39  ;;  %v1144_v61 = vadd.f32 %v1143_v59, %v2965_v32 }
 0x375   :  { %v1232_v46 = vmul.f32 0.01, %v1142_v58 }
 0x376   :  { %v1233_v53 = vmul.f32 0.01, %v1144_v61  ;;  %v1147_v49 = vpop.f32.mrb[20].mxu0  ;;  %1434 = vmatprep.mubr.f32.mxu0 %v1263_v2 }
 0x377   :  { %v1148_v35 = vadd.f32 %v1147_v49, %v2962_v17  ;;  %v1149_v0 = vpop.f32.mrb[21].mxu0  ;;  %1435 = vmatmul.mubr.f32.vlgmr.msra.gmra.mrb[48].mxu0 %v1262_v62  ;;  %v1264_v3 = vmax.f32 %v1142_v58, %v1232_v46 }
 0x378   :  { %v1265_v54 = vmax.f32 %v1144_v61, %v1233_v53  ;;  %v1150_v57 = vadd.f32 %v1149_v0, %v2965_v32 }
 0x379   :  { %v1234_v4 = vmul.f32 0.01, %v1148_v35 }
 0x37a   :  { %v1235_v1 = vmul.f32 0.01, %v1150_v57  ;;  %v1153_v60 = vpop.f32.mrb[22].mxu0  ;;  %1440 = vmatprep.mubr.f32.mxu0 %v1265_v54 }
 0x37b   :  { %v1154_v5 = vadd.f32 %v1153_v60, %v2962_v17  ;;  %v1155_v7 = vpop.f32.mrb[23].mxu0  ;;  %1441 = vmatmul.mubr.f32.gmra.mrb[50].mxu0 %v1264_v3  ;;  %v1266_v9 = vmax.f32 %v1148_v35, %v1234_v4 }
 0x37c   :  { %v1267_v33 = vmax.f32 %v1150_v57, %v1235_v1  ;;  %v1156_v8 = vadd.f32 %v1155_v7, %v2965_v32 }
 0x37d   :  { %v1236_v11 = vmul.f32 0.01, %v1154_v5 }
 0x37e   :  { %v1237_v12 = vmul.f32 0.01, %v1156_v8  ;;  %1446 = vmatprep.mubr.f32.mxu0 %v1267_v33 }
 0x37f   :  { %v1159_v13 = vpop.f32.mrb[24].mxu0  ;;  %1447 = vmatmul.mubr.f32.gmra.mrb[52].mxu0 %v1266_v9  ;;  %v1268_v44 = vmax.f32 %v1154_v5, %v1236_v11 }
 0x380   :  { %v1269_v14 = vmax.f32 %v1156_v8, %v1237_v12  ;;  %v1160_v40 = vadd.f32 %v1159_v13, %v2962_v17  ;;  %v1161_v15 = vpop.f32.mrb[25].mxu0 }
 0x381   :  { %v1162_v6 = vadd.f32 %v1161_v15, %v2965_v32 }
 0x382   :  { %v1238_v16 = vmul.f32 0.01, %v1160_v40  ;;  %1452 = vmatprep.mubr.f32.mxu0 %v1269_v14 }
 0x383   :  { %v1239_v24 = vmul.f32 0.01, %v1162_v6  ;;  %v1165_v18 = vpop.f32.mrb[26].mxu0  ;;  %1453 = vmatmul.mubr.f32.gmra.mrb[54].mxu0 %v1268_v44 }
 0x384   :  { %v1166_v25 = vadd.f32 %v1165_v18, %v2962_v17  ;;  %v1167_v19 = vpop.f32.mrb[27].mxu0  ;;  %v1270_v20 = vmax.f32 %v1160_v40, %v1238_v16 }
 0x385   :  { %v1271_v26 = vmax.f32 %v1162_v6, %v1239_v24  ;;  %v1168_v10 = vadd.f32 %v1167_v19, %v2965_v32 }
 0x386   :  { %v1240_v21 = vmul.f32 0.01, %v1166_v25 }
 0x387   :  { %v1241_v22 = vmul.f32 0.01, %v1168_v10  ;;  %1458 = vmatprep.mubr.f32.mxu0 %v1271_v26 }
 0x388   :  { %1459 = vmatmul.mubr.f32.gmra.mrb[56].mxu0 %v1270_v20  ;;  %v1272_v28 = vmax.f32 %v1166_v25, %v1240_v21 }
 0x389   :  { %v1273_v27 = vmax.f32 %v1168_v10, %v1241_v22 }
 0x38b   :  { %1464 = vmatprep.mubr.f32.mxu1 %v1273_v27 }
 0x38c   :  { %1465 = vmatmul.mubr.f32.vlgmr.msra.gmra.mrb[16].mxu1 %v1272_v28 }
 0x398   :  { %v1171_v29 = vpop.f32.mrb[28].mxu0 }
 0x399   :  { %v1172_v30 = vadd.f32 %v1171_v29, %v2962_v17  ;;  %v1173_v34 = vpop.f32.mrb[29].mxu0 }
 0x39a   :  { %v1174_v36 = vadd.f32 %v1173_v34, %v2965_v32 }
 0x39b   :  { %v1242_v23 = vmul.f32 0.01, %v1172_v30 }
 0x39c   :  { %v1243_v37 = vmul.f32 0.01, %v1174_v36  ;;  %v1177_v31 = vpop.f32.mrb[30].mxu0 }
 0x39d   :  { %v1178_v42 = vadd.f32 %v1177_v31, %v2962_v17  ;;  %v1179_v45 = vpop.f32.mrb[31].mxu0  ;;  %v1274_v63 = vmax.f32 %v1172_v30, %v1242_v23 }
 0x39e   :  { %v1275_v47 = vmax.f32 %v1174_v36, %v1243_v37  ;;  %v1180_v50 = vadd.f32 %v1179_v45, %v2965_v32 }
 0x39f   :  { %v1244_v51 = vmul.f32 0.01, %v1178_v42 }
 0x3a0   :  { %v1245_v52 = vmul.f32 0.01, %v1180_v50  ;;  %1470 = vmatprep.mubr.f32.mxu1 %v1275_v47 }
 0x3a1   :  { %1471 = vmatmul.mubr.f32.gmra.mrb[18].mxu1 %v1274_v63  ;;  %v1276_v39 = vmax.f32 %v1178_v42, %v1244_v51 }
 0x3a2   :  { %v1277_v55 = vmax.f32 %v1180_v50, %v1245_v52 }
 0x3a4   :  { %1476 = vmatprep.mubr.f32.mxu1 %v1277_v55 }
 0x3a5   :  { %1477 = vmatmul.mubr.f32.gmra.mrb[20].mxu1 %v1276_v39 }
 0x3b3   :  { %v1183_v56 = vpop.f32.mrb[32].mxu0 }
 0x3b4   :  { %v1184_v58 = vadd.f32 %v1183_v56, %v2962_v17  ;;  %v1185_v59 = vpop.f32.mrb[33].mxu0 }
 0x3b5   :  { %v1186_v2 = vadd.f32 %v1185_v59, %v2965_v32 }
 0x3b6   :  { %v1246_v61 = vmul.f32 0.01, %v1184_v58 }
 0x3b7   :  { %v1247_v62 = vmul.f32 0.01, %v1186_v2  ;;  %v1189_v46 = vpop.f32.mrb[34].mxu0 }
 0x3b8   :  { %v1190_v53 = vadd.f32 %v1189_v46, %v2962_v17  ;;  %v1191_v49 = vpop.f32.mrb[35].mxu0  ;;  %v1278_v54 = vmax.f32 %v1184_v58, %v1246_v61  ;;  %v1358_v46 = vld [vmem:[%s3360_s10] sm:$0x3]  ;;  %s2468_s10 = smov [#allocation8]  }
 0x3b9   :  { %v1279_v35 = vmax.f32 %v1186_v2, %v1247_v62  ;;  %v1192_v0 = vadd.f32 %v1191_v49, %v2965_v32 }
 0x3ba   :  { %v1248_v57 = vmul.f32 0.01, %v1190_v53 }
 0x3bb   :  { %v1249_v3 = vmul.f32 0.01, %v1192_v0  ;;  %1482 = vmatprep.mubr.f32.mxu1 %v1279_v35 }
 0x3bc   :  { %1483 = vmatmul.mubr.f32.gmra.mrb[22].mxu1 %v1278_v54  ;;  %v1280_v1 = vmax.f32 %v1190_v53, %v1248_v57  ;;  %v3003_v53 = vrot.slane %v1358_v46, %v2707_v43 }
 0x3bd   :  { %v1281_v4 = vmax.f32 %v1192_v0, %v1249_v3 }
 0x3bf   :  { %1488 = vmatprep.mubr.f32.mxu1 %v1281_v4 }
 0x3c0   :  { %1489 = vmatmul.mubr.f32.gmra.mrb[24].mxu1 %v1280_v1 }
 0x3cb   :  { %v1195_v60 = vpop.f32.mrb[36].mxu0 }
 0x3cc   :  { %v1196_v5 = vadd.f32 %v1195_v60, %v2962_v17  ;;  %v1197_v7 = vpop.f32.mrb[37].mxu0 }
 0x3cd   :  { %v1198_v33 = vadd.f32 %v1197_v7, %v2965_v32 }
 0x3ce   :  { %v1250_v8 = vmul.f32 0.01, %v1196_v5 }
 0x3cf   :  { %v1251_v9 = vmul.f32 0.01, %v1198_v33  ;;  %v1201_v11 = vpop.f32.mrb[38].mxu0 }
 0x3d0   :  { %v1202_v12 = vadd.f32 %v1201_v11, %v2962_v17  ;;  %v1203_v13 = vpop.f32.mrb[39].mxu0  ;;  %v1282_v15 = vmax.f32 %v1196_v5, %v1250_v8 }
 0x3d1   :  { %v1283_v14 = vmax.f32 %v1198_v33, %v1251_v9  ;;  %v1204_v40 = vadd.f32 %v1203_v13, %v2965_v32 }
 0x3d2   :  { %v1252_v44 = vmul.f32 0.01, %v1202_v12 }
 0x3d3   :  { %v1253_v6 = vmul.f32 0.01, %v1204_v40  ;;  %1494 = vmatprep.mubr.f32.mxu1 %v1283_v14 }
 0x3d4   :  { %1495 = vmatmul.mubr.f32.gmra.mrb[26].mxu1 %v1282_v15  ;;  %v1284_v24 = vmax.f32 %v1202_v12, %v1252_v44 }
 0x3d5   :  { %v1285_v16 = vmax.f32 %v1204_v40, %v1253_v6 }
 0x3d7   :  { %1500 = vmatprep.mubr.f32.mxu1 %v1285_v16 }
 0x3d8   :  { %1501 = vmatmul.mubr.f32.gmra.mrb[28].mxu1 %v1284_v24 }
 0x3e4   :  { %v1207_v18 = vpop.f32.mrb[40].mxu0 }
 0x3e5   :  { %v1208_v25 = vadd.f32 %v1207_v18, %v2962_v17  ;;  %v1209_v19 = vpop.f32.mrb[41].mxu0 }
 0x3e6   :  { %v1210_v26 = vadd.f32 %v1209_v19, %v2965_v32 }
 0x3e7   :  { %v1254_v10 = vmul.f32 0.01, %v1208_v25 }
 0x3e8   :  { %v1255_v20 = vmul.f32 0.01, %v1210_v26  ;;  %v1213_v21 = vpop.f32.mrb[42].mxu0 }
 0x3e9   :  { %v1214_v22 = vadd.f32 %v1213_v21, %v2962_v17  ;;  %v1215_v27 = vpop.f32.mrb[43].mxu0  ;;  %v1286_v30 = vmax.f32 %v1208_v25, %v1254_v10 }
 0x3ea   :  { %v1287_v28 = vmax.f32 %v1210_v26, %v1255_v20  ;;  %v1216_v29 = vadd.f32 %v1215_v27, %v2965_v32 }
 0x3eb   :  { %v1256_v34 = vmul.f32 0.01, %v1214_v22 }
 0x3ec   :  { %v1257_v36 = vmul.f32 0.01, %v1216_v29  ;;  %1506 = vmatprep.mubr.f32.mxu1 %v1287_v28 }
 0x3ed   :  { %1507 = vmatmul.mubr.f32.gmra.mrb[30].mxu1 %v1286_v30  ;;  %v1288_v37 = vmax.f32 %v1214_v22, %v1256_v34 }
 0x3ee   :  { %v1289_v23 = vmax.f32 %v1216_v29, %v1257_v36 }
 0x3f0   :  { %1512 = vmatprep.mubr.f32.mxu1 %v1289_v23 }
 0x3f1   :  { %1513 = vmatmul.mubr.f32.gmra.mrb[32].mxu1 %v1288_v37 }
 0x3ff   :  { %v1219_v31 = vpop.f32.mrb[44].mxu0 }
 0x400   :  { %v1220_v42 = vadd.f32 %v1219_v31, %v2962_v17  ;;  %v1221_v45 = vpop.f32.mrb[45].mxu0 }
 0x401   :  { %v1222_v47 = vadd.f32 %v1221_v45, %v2965_v32 }
 0x402   :  { %v1258_v50 = vmul.f32 0.01, %v1220_v42 }
 0x403   :  { %v1259_v63 = vmul.f32 0.01, %v1222_v47  ;;  %v1225_v51 = vpop.f32.mrb[46].mxu0 }
 0x404   :  { %v1226_v52 = vadd.f32 %v1225_v51, %v2962_v17  ;;  %v1227_v55 = vpop.f32.mrb[47].mxu0  ;;  %v1290_v58 = vmax.f32 %v1220_v42, %v1258_v50  ;;  %v1563_v17 = vld [vmem:[%s3361_s11] sm:$0x3]  ;;  %s1960_s11 = sshll.u32 %s2468_s10, 4  ;;  %s1961_s11 = int_to_ptr.vmem [resolvable:$true] %s1960_s11 }
 0x405   :  { %v1291_v39 = vmax.f32 %v1222_v47, %v1259_v63  ;;  %v1228_v56 = vadd.f32 %v1227_v55, %v2965_v32  ;;  %v3009_v32 = vrot.slane %v1358_v46, %v2720_v48  ;;  %v3013_v0 = vrot.slane %v1563_v17, %v2707_v43  ;;  %s2431_s1 = scalar_lea.vmem %s1961_s11, 16  ;;  %s2435_s17 = scalar_lea.vmem %s1961_s11, 32 }
 0x406   :  { %v1260_v59 = vmul.f32 0.01, %v1226_v52  ;;  %v3017_v3 = vrot.slane %v1563_v17, %v2720_v48  ;;  %p2432_p2 = scmp.ne.s32.totalorder %s1961_s11, %s2431_s1  ;;  %p2436_p3 = scmp.lt.s32.totalorder %s1961_s11, %s1961_s11 }
 0x407   :  { %v1261_v2 = vmul.f32 0.01, %v1228_v56  ;;  %1518 = vmatprep.mubr.f32.mxu1 %v1291_v39  ;;  %p2437_p4 = scmp.lt.s32.totalorder %s2435_s17, %s2431_s1 }
 0x408   :  { %1519 = vmatmul.mubr.f32.gmra.mrb[34].mxu1 %v1290_v58  ;;  %v1292_v62 = vmax.f32 %v1226_v52, %v1260_v59 }
 0x409   :  { %v1293_v61 = vmax.f32 %v1228_v56, %v1261_v2  ;;  %p2438_p5 = por %p2437_p4, %p2436_p3 }
 0x40b   :  { %1524 = vmatprep.mubr.f32.mxu1 %v1293_v61  ;;  %p2439_p6 = pnand %p2438_p5, %p2432_p2 }
 0x40c   :  { %1525 = vmatmul.mubr.f32.gmra.mrb[36].mxu1 %v1292_v62 }
 0x44a   :  { %v1436_v49 = vpop.f32.mrb[48].mxu0 }
 0x44b   :  { %v1437_v35 = vadd.f32 %v1436_v49, %v3003_v53  ;;  %v1438_v54 = vpop.f32.mrb[49].mxu0 }
 0x44c   :  { %v1439_v57 = vadd.f32 %v1438_v54, %v3009_v32 }
 0x44d   :  { %v1531_v4 = vmax.f32 %v1437_v35, 0.0 }
 0x44e   :  { %v1532_v1 = vmax.f32 %v1439_v57, 0.0  ;;  %v1442_v60 = vpop.f32.mrb[50].mxu0 }
 0x44f   :  { %v1575_v5 = vmul.f32 %v3013_v0, %v1531_v4  ;;  %v1443_v7 = vadd.f32 %v1442_v60, %v3003_v53  ;;  %v1444_v33 = vpop.f32.mrb[51].mxu0 }
 0x450   :  { %v1576_v8 = vmul.f32 %v3017_v3, %v1532_v1  ;;  %v1445_v9 = vadd.f32 %v1444_v33, %v3009_v32 }
 0x451   :  { %v1533_v11 = vmax.f32 %v1443_v7, 0.0 }
 0x452   :  { %v1534_v12 = vmax.f32 %v1445_v9, 0.0  ;;  %v1448_v13 = vpop.f32.mrb[52].mxu0  ;;  %v1607_v14 = vadd.f32 %v1576_v8, %v1575_v5 }
 0x453   :  { %v1577_v40 = vmul.f32 %v3013_v0, %v1533_v11  ;;  %v1449_v48 = vadd.f32 %v1448_v13, %v3003_v53  ;;  %v1450_v15 = vpop.f32.mrb[53].mxu0  ;;  %v1655_v11 = vld [vmem:[#allocation2] sm:$0x1] }
 0x454   :  { %v1578_v44 = vmul.f32 %v3017_v3, %v1534_v12  ;;  %v1451_v6 = vadd.f32 %v1450_v15, %v3009_v32  ;;  %1608 = vadd.xlane.f32.xlu0 %v1607_v14 }
 0x455   :  { %v1535_v16 = vmax.f32 %v1449_v48, 0.0 }
 0x456   :  { %v1536_v24 = vmax.f32 %v1451_v6, 0.0  ;;  %v1454_v18 = vpop.f32.mrb[54].mxu0  ;;  %v1610_v25 = vadd.f32 %v1578_v44, %v1577_v40 }
 0x457   :  { %v1579_v19 = vmul.f32 %v3013_v0, %v1535_v16  ;;  %v1455_v26 = vadd.f32 %v1454_v18, %v3003_v53  ;;  %v1456_v10 = vpop.f32.mrb[55].mxu0 }
 0x458   :  { %v1580_v20 = vmul.f32 %v3017_v3, %v1536_v24  ;;  %v1457_v21 = vadd.f32 %v1456_v10, %v3009_v32  ;;  %1611 = vadd.xlane.f32.xlu1 %v1610_v25 }
 0x459   :  { %v1537_v22 = vmax.f32 %v1455_v26, 0.0 }
 0x45a   :  { %v1538_v27 = vmax.f32 %v1457_v21, 0.0  ;;  %v1613_v28 = vadd.f32 %v1580_v20, %v1579_v19 }
 0x45b   :  { %v1581_v29 = vmul.f32 %v3013_v0, %v1537_v22  ;;  %v1460_v30 = vpop.f32.mrb[56].mxu0 }
 0x45c   :  { %v1582_v34 = vmul.f32 %v3017_v3, %v1538_v27  ;;  %v1461_v36 = vadd.f32 %v1460_v30, %v3003_v53  ;;  %v1462_v23 = vpop.f32.mrb[57].mxu0  ;;  %1614 = vadd.xlane.f32.xlu0 %v1613_v28 }
 0x45d   :  { %v1463_v37 = vadd.f32 %v1462_v23, %v3009_v32 }
 0x45e   :  { %v1539_v31 = vmax.f32 %v1461_v36, 0.0  ;;  %v1616_v42 = vadd.f32 %v1582_v34, %v1581_v29 }
 0x45f   :  { %v1540_v45 = vmax.f32 %v1463_v37, 0.0  ;;  %v1466_v47 = vpop.f32.mrb[16].mxu1 }
 0x460   :  { %v1583_v50 = vmul.f32 %v3013_v0, %v1539_v31  ;;  %v1467_v63 = vadd.f32 %v1466_v47, %v3003_v53  ;;  %v1468_v51 = vpop.f32.mrb[17].mxu1  ;;  %1617 = vadd.xlane.f32.xlu0 %v1616_v42 }
 0x461   :  { %v1584_v52 = vmul.f32 %v3017_v3, %v1540_v45  ;;  %v1469_v55 = vadd.f32 %v1468_v51, %v3009_v32 }
 0x462   :  { %v1541_v39 = vmax.f32 %v1467_v63, 0.0 }
 0x463   :  { %v1542_v56 = vmax.f32 %v1469_v55, 0.0  ;;  %v1619_v58 = vadd.f32 %v1584_v52, %v1583_v50 }
 0x464   :  { %v1585_v59 = vmul.f32 %v3013_v0, %v1541_v39 }
 0x465   :  { %v1586_v2 = vmul.f32 %v3017_v3, %v1542_v56  ;;  %1620 = vadd.xlane.f32.xlu1 %v1619_v58 }
 0x467   :  { %v1622_v61 = vadd.f32 %v1586_v2, %v1585_v59 }
 0x469   :  { %1623 = vadd.xlane.f32.xlu0 %v1622_v61 }
 0x474   :  { %v1472_v62 = vpop.f32.mrb[18].mxu1 }
 0x475   :  { %v1473_v46 = vadd.f32 %v1472_v62, %v3003_v53  ;;  %v1474_v17 = vpop.f32.mrb[19].mxu1 }
 0x476   :  { %v1475_v49 = vadd.f32 %v1474_v17, %v3009_v32 }
 0x477   :  { %v1543_v35 = vmax.f32 %v1473_v46, 0.0 }
 0x478   :  { %v1544_v54 = vmax.f32 %v1475_v49, 0.0  ;;  %v1478_v57 = vpop.f32.mrb[20].mxu1 }
 0x479   :  { %v1587_v4 = vmul.f32 %v3013_v0, %v1543_v35  ;;  %v1479_v1 = vadd.f32 %v1478_v57, %v3003_v53  ;;  %v1480_v60 = vpop.f32.mrb[21].mxu1 }
 0x47a   :  { %v1588_v5 = vmul.f32 %v3017_v3, %v1544_v54  ;;  %v1481_v7 = vadd.f32 %v1480_v60, %v3009_v32 }
 0x47b   :  { %v1545_v33 = vmax.f32 %v1479_v1, 0.0 }
 0x47c   :  { %v1546_v8 = vmax.f32 %v1481_v7, 0.0  ;;  %v1625_v9 = vadd.f32 %v1588_v5, %v1587_v4 }
 0x47d   :  { %v1589_v12 = vmul.f32 %v3013_v0, %v1545_v33 }
 0x47e   :  { %v1590_v13 = vmul.f32 %v3017_v3, %v1546_v8  ;;  %1626 = vadd.xlane.f32.xlu1 %v1625_v9 }
 0x47f   :  { %1658 = vperm.xlu0 %2322, %v1655_v11  }
 0x480   :  { %v1628_v14 = vadd.f32 %v1590_v13, %v1589_v12 }
 0x482   :  { %1629 = vadd.xlane.f32.xlu1 %v1628_v14 }
 0x48f   :  { %v1484_v40 = vpop.f32.mrb[22].mxu1 }
 0x490   :  { %v1485_v48 = vadd.f32 %v1484_v40, %v3003_v53  ;;  %v1486_v15 = vpop.f32.mrb[23].mxu1 }
 0x491   :  { %v1487_v44 = vadd.f32 %v1486_v15, %v3009_v32 }
 0x492   :  { %v1547_v6 = vmax.f32 %v1485_v48, 0.0 }
 0x493   :  { %v1548_v16 = vmax.f32 %v1487_v44, 0.0  ;;  %v1490_v24 = vpop.f32.mrb[24].mxu1 }
 0x494   :  { %v1591_v18 = vmul.f32 %v3013_v0, %v1547_v6  ;;  %v1491_v25 = vadd.f32 %v1490_v24, %v3003_v53  ;;  %v1492_v19 = vpop.f32.mrb[25].mxu1 }
 0x495   :  { %v1592_v26 = vmul.f32 %v3017_v3, %v1548_v16  ;;  %v1493_v10 = vadd.f32 %v1492_v19, %v3009_v32 }
 0x496   :  { %v1549_v20 = vmax.f32 %v1491_v25, 0.0 }
 0x497   :  { %v1550_v21 = vmax.f32 %v1493_v10, 0.0  ;;  %v1631_v22 = vadd.f32 %v1592_v26, %v1591_v18 }
 0x498   :  { %v1593_v27 = vmul.f32 %v3013_v0, %v1549_v20 }
 0x499   :  { %v1594_v28 = vmul.f32 %v3017_v3, %v1550_v21  ;;  %1632 = vadd.xlane.f32.xlu1 %v1631_v22 }
 0x49b   :  { %v1634_v29 = vadd.f32 %v1594_v28, %v1593_v27 }
 0x49d   :  { %1635 = vadd.xlane.f32.xlu1 %v1634_v29 }
 0x4a7   :  { %v1496_v30 = vpop.f32.mrb[26].mxu1 }
 0x4a8   :  { %v1497_v34 = vadd.f32 %v1496_v30, %v3003_v53  ;;  %v1498_v36 = vpop.f32.mrb[27].mxu1 }
 0x4a9   :  { %v1499_v23 = vadd.f32 %v1498_v36, %v3009_v32 }
 0x4aa   :  { %v1551_v37 = vmax.f32 %v1497_v34, 0.0 }
 0x4ab   :  { %v1552_v31 = vmax.f32 %v1499_v23, 0.0  ;;  %v1502_v42 = vpop.f32.mrb[28].mxu1 }
 0x4ac   :  { %v1595_v45 = vmul.f32 %v3013_v0, %v1551_v37  ;;  %v1503_v47 = vadd.f32 %v1502_v42, %v3003_v53  ;;  %v1504_v50 = vpop.f32.mrb[29].mxu1 }
 0x4ad   :  { %v1596_v63 = vmul.f32 %v3017_v3, %v1552_v31  ;;  %v1505_v51 = vadd.f32 %v1504_v50, %v3009_v32 }
 0x4ae   :  { %v1553_v52 = vmax.f32 %v1503_v47, 0.0 }
 0x4af   :  { %v1554_v55 = vmax.f32 %v1505_v51, 0.0  ;;  %v1637_v39 = vadd.f32 %v1596_v63, %v1595_v45 }
 0x4b0   :  { %v1597_v56 = vmul.f32 %v3013_v0, %v1553_v52 }
 0x4b1   :  { %v1598_v58 = vmul.f32 %v3017_v3, %v1554_v55  ;;  %1638 = vadd.xlane.f32.xlu1 %v1637_v39 }
 0x4b3   :  { %v1640_v59 = vadd.f32 %v1598_v58, %v1597_v56 }
 0x4b5   :  { %1641 = vadd.xlane.f32.xlu1 %v1640_v59 }
 0x4c0   :  { %v1508_v2 = vpop.f32.mrb[30].mxu1 }
 0x4c1   :  { %v1509_v61 = vadd.f32 %v1508_v2, %v3003_v53  ;;  %v1510_v62 = vpop.f32.mrb[31].mxu1 }
 0x4c2   :  { %v1511_v46 = vadd.f32 %v1510_v62, %v3009_v32 }
 0x4c3   :  { %v1555_v17 = vmax.f32 %v1509_v61, 0.0 }
 0x4c4   :  { %v1556_v49 = vmax.f32 %v1511_v46, 0.0  ;;  %v1514_v35 = vpop.f32.mrb[32].mxu1 }
 0x4c5   :  { %v1599_v54 = vmul.f32 %v3013_v0, %v1555_v17  ;;  %v1515_v57 = vadd.f32 %v1514_v35, %v3003_v53  ;;  %v1516_v4 = vpop.f32.mrb[33].mxu1 }
 0x4c6   :  { %v1600_v1 = vmul.f32 %v3017_v3, %v1556_v49  ;;  %v1517_v60 = vadd.f32 %v1516_v4, %v3009_v32 }
 0x4c7   :  { %v1557_v5 = vmax.f32 %v1515_v57, 0.0 }
 0x4c8   :  { %v1558_v7 = vmax.f32 %v1517_v60, 0.0  ;;  %v1643_v33 = vadd.f32 %v1600_v1, %v1599_v54 }
 0x4c9   :  { %v1601_v8 = vmul.f32 %v3013_v0, %v1557_v5 }
 0x4ca   :  { %v1602_v9 = vmul.f32 %v3017_v3, %v1558_v7  ;;  %1644 = vadd.xlane.f32.xlu1 %v1643_v33 }
 0x4cc   :  { %v1646_v11 = vadd.f32 %v1602_v9, %v1601_v8 }
 0x4ce   :  { %1647 = vadd.xlane.f32.xlu1 %v1646_v11 }
 0x4db   :  { %v1520_v12 = vpop.f32.mrb[34].mxu1 }
 0x4dc   :  { %v1521_v13 = vadd.f32 %v1520_v12, %v3003_v53  ;;  %v1522_v14 = vpop.f32.mrb[35].mxu1 }
 0x4dd   :  { %v1523_v40 = vadd.f32 %v1522_v14, %v3009_v32 }
 0x4de   :  { %v1559_v48 = vmax.f32 %v1521_v13, 0.0 }
 0x4df   :  { %v1560_v15 = vmax.f32 %v1523_v40, 0.0  ;;  %v1526_v44 = vpop.f32.mrb[36].mxu1 }
 0x4e0   :  { %v1603_v6 = vmul.f32 %v3013_v0, %v1559_v48  ;;  %v1527_v16 = vadd.f32 %v1526_v44, %v3003_v53  ;;  %v1528_v24 = vpop.f32.mrb[37].mxu1 }
 0x4e1   :  { %v1604_v18 = vmul.f32 %v3017_v3, %v1560_v15  ;;  %v1529_v25 = vadd.f32 %v1528_v24, %v3009_v32  ;;  %v1609_v27 = vpop.xlane.xlu0 %1608 }
 0x4e2   :  { %v1561_v19 = vmax.f32 %v1527_v16, 0.0 }
 0x4e3   :  { %v1562_v26 = vmax.f32 %v1529_v25, 0.0  ;;  %v1649_v10 = vadd.f32 %v1604_v18, %v1603_v6 }
 0x4e4   :  { %v1605_v20 = vmul.f32 %v3013_v0, %v1561_v19 }
 0x4e5   :  { %v1606_v21 = vmul.f32 %v3017_v3, %v1562_v26  ;;  %1650 = vadd.xlane.f32.xlu1 %v1649_v10  ;;  %v1612_v28 = vpop.xlane.xlu1 %1611 }
 0x4e7   :  { %v1652_v22 = vadd.f32 %v1606_v21, %v1605_v20 }
 0x4e9   :  { %1653 = vadd.xlane.f32.xlu1 %v1652_v22  ;;  %v1615_v29 = vpop.xlane.xlu0 %1614 }
 0x4ed   :  { %v1618_v53 = vpop.xlane.xlu0 %1617 }
 0x4f2   :  { %v1621_v30 = vpop.xlane.xlu1 %1620 }
 0x4f6   :  { %v1624_v36 = vpop.xlane.xlu0 %1623 }
 0x4fe   :  { %v1659_v23 = vpop.permute.xlu0 %1658 }
 0x4ff   :  { %v3082_v32 = vrot.slane %v1659_v23, %v2707_v43 }
 0x501   :  { %v3085_v0 = vadd.f32 %v3082_v32, %v1609_v27  ;;  %v3088_v3 = vadd.f32 %v3082_v32, %v1612_v28  ;;  %v3091_v45 = vadd.f32 %v3082_v32, %v1615_v29  ;;  %v3097_v56 = vadd.f32 %v3082_v32, %v1618_v53 }
 0x502   :  { %v3100_v2 = vadd.f32 %v3082_v32, %v1621_v30  ;;  %v3103_v61 = vadd.f32 %v3082_v32, %v1624_v36 }
 0x503   :  { %v1681_v47 = vand.u32 2147483647, %v3085_v0  ;;  %v1682_v50 = vand.u32 2147483647, %v3088_v3  ;;  %v1683_v51 = vand.u32 2147483647, %v3091_v45 }
 0x504   :  { %v1684_v17 = vand.u32 2147483647, %v3097_v56  ;;  %v1685_v35 = vand.u32 2147483647, %v3100_v2  ;;  %v1686_v54 = vand.u32 2147483647, %v3103_v61 }
 0x505   :  { %v1697_v43 = vsub.f32 0.0, %v1681_v47  ;;  %v1698_v52 = vsub.f32 0.0, %v1682_v50  ;;  %v1699_v55 = vsub.f32 0.0, %v1683_v51  ;;  %v3150_v51 = vand.u32 127, %v173_v38 }
 0x506   :  { %v1700_v60 = vsub.f32 0.0, %v1684_v17  ;;  %v1701_v5 = vsub.f32 0.0, %v1685_v35  ;;  %v1702_v33 = vsub.f32 0.0, %v1686_v54  ;;  %vm1745_vm3 = vcmp.ge.f32.partialorder %v3085_v0, 0.0 }
 0x507   :  { %v1713_v39 = vmul.f32 1.442695, %v1697_v43  ;;  %v1715_v58 = vmul.f32 1.442695, %v1698_v52  ;;  %v1717_v46 = vmul.f32 1.442695, %v1699_v55 }
 0x508   :  { %v1719_v40 = vmul.f32 1.442695, %v1700_v60  ;;  %v1721_v44 = vmul.f32 1.442695, %v1701_v5  ;;  %v1723_v18 = vmul.f32 1.442695, %v1702_v33 }
 0x509   :  { %2323 = vpow2.f32 %v1713_v39  ;;  %v3165_v38 = vadd.s32 4294967272, %v3150_v51  ;;  %v3170_v35 = vadd.s32 4294967264, %v3150_v51  ;;  %v3177_v5 = vadd.s32 4294967256, %v3150_v51 }
 0x50a   :  { %2325 = vpow2.f32 %v1715_v58  ;;  %v3180_v33 = vadd.s32 4294967248, %v3150_v51  ;;  %vm1746_vm4 = vcmp.ge.f32.partialorder %v3088_v3, 0.0  ;;  %vm1747_vm6 = vcmp.ge.f32.partialorder %v3091_v45, 0.0 }
 0x50b   :  { %v1627_v34 = vpop.xlane.xlu1 %1626  ;;  %2327 = vpow2.f32 %v1717_v46  ;;  %v3162_v46 = vadd.s32 4294967280, %v3150_v51  ;;  %vm1748_vm9 = vcmp.ge.f32.partialorder %v3097_v56, 0.0  ;;  %vm1749_vm10 = vcmp.ge.f32.partialorder %v3100_v2, 0.0 }
 0x50c   :  { %v3106_v62 = vadd.f32 %v3082_v32, %v1627_v34  ;;  %2329 = vpow2.f32 %v1719_v40  ;;  %vm1750_vm11 = vcmp.ge.f32.partialorder %v3103_v61, 0.0 }
 0x50d   :  { %2331 = vpow2.f32 %v1721_v44 }
 0x50e   :  { %v1687_v4 = vand.u32 2147483647, %v3106_v62  ;;  %2333 = vpow2.f32 %v1723_v18  ;;  %v1864_v18 = vsub.s32 %v3165_v38, %v2704_v41  ;;  %vm1751_vm14 = vcmp.ge.f32.partialorder %v3106_v62, 0.0 }
 0x50f   :  { %v1630_v37 = vpop.xlane.xlu1 %1629  ;;  %v1938_v62 = vadd.s32 4294967184, %v3150_v51 }
 0x510   :  { %v3112_v57 = vadd.f32 %v3082_v32, %v1630_v37  ;;  %v1703_v12 = vsub.f32 0.0, %v1687_v4 }
 0x512   :  { %v1688_v8 = vand.u32 2147483647, %v3112_v57  ;;  %v1725_v26 = vmul.f32 1.442695, %v1703_v12  ;;  %v1845_v12 = vsub.s32 %v3150_v51, %v2704_v41  ;;  %vm1752_vm0 = vcmp.ge.f32.partialorder %v3112_v57, 0.0 }
 0x513   :  { %v3132_v15 = vpop.eup %2323 }
 0x514   :  { %v3138_v24 = vpop.eup %2325  ;;  %v1704_v25 = vsub.f32 0.0, %v1688_v8  ;;  %v1777_v21 = vadd.f32 1.0, %v3132_v15  ;;  %2335 = vpow2.f32 %v1725_v26 }
 0x515   :  { %v3144_v27 = vpop.eup %2327  ;;  %v1778_v28 = vadd.f32 1.0, %v3138_v24 }
 0x516   :  { %v1727_v53 = vmul.f32 1.442695, %v1704_v25  ;;  %v1779_v37 = vadd.f32 1.0, %v3144_v27  ;;  %2337 = vrcp.f32 %v1777_v21  ;;  %v3152_v55 = vpop.eup %2329 }
 0x517   :  { %2339 = vrcp.f32 %v1778_v28  ;;  %v3154_v39 = vpop.eup %2331  ;;  %v1780_v54 = vadd.f32 1.0, %v3152_v55  ;;  %v1878_v28 = vsub.s32 %v3177_v5, %v2704_v41 }
 0x518   :  { %2341 = vpow2.f32 %v1727_v53  ;;  %v3156_v58 = vpop.eup %2333  ;;  %v1781_v8 = vadd.f32 1.0, %v3154_v39 }
 0x519   :  { %v1782_v25 = vadd.f32 1.0, %v3156_v58 }
 0x526   :  { %v1633_v31 = vpop.xlane.xlu1 %1632 }
 0x527   :  { %v3116_v1 = vadd.f32 %v3082_v32, %v1633_v31 }
 0x529   :  { %v1689_v13 = vand.u32 2147483647, %v3116_v1 }
 0x52a   :  { %v1636_v42 = vpop.xlane.xlu1 %1635 }
 0x52b   :  { %v3119_v7 = vadd.f32 %v3082_v32, %v1636_v42  ;;  %v1705_v10 = vsub.f32 0.0, %v1689_v13 }
 0x52d   :  { %v1690_v6 = vand.u32 2147483647, %v3119_v7  ;;  %v1729_v36 = vmul.f32 1.442695, %v1705_v10  ;;  %v1871_v10 = vsub.s32 %v3170_v35, %v2704_v41 }
 0x52f   :  { %v1706_v29 = vsub.f32 0.0, %v1690_v6  ;;  %2343 = vpow2.f32 %v1729_v36  ;;  %v1857_v6 = vsub.s32 %v3162_v46, %v2704_v41 }
 0x530   :  { %2345 = vrcp.f32 %v1779_v37 }
 0x531   :  { %v1731_v42 = vmul.f32 1.442695, %v1706_v29  ;;  %v1885_v29 = vsub.s32 %v3180_v33, %v2704_v41  ;;  %v1945_v33 = vadd.s32 4294967176, %v3150_v51 }
 0x533   :  { %2347 = vpow2.f32 %v1731_v42 }
 0x53e   :  { %v1639_v63 = vpop.xlane.xlu1 %1638 }
 0x53f   :  { %v3123_v9 = vadd.f32 %v3082_v32, %v1639_v63 }
 0x541   :  { %v1691_v19 = vand.u32 2147483647, %v3123_v9 }
 0x542   :  { %v1642_v59 = vpop.xlane.xlu1 %1641 }
 0x543   :  { %v3127_v14 = vadd.f32 %v3082_v32, %v1642_v59  ;;  %v1707_v34 = vsub.f32 0.0, %v1691_v19  ;;  %v3159_v59 = vadd.s32 4294967288, %v3150_v51 }
 0x545   :  { %v1692_v20 = vand.u32 2147483647, %v3127_v14  ;;  %v1733_v50 = vmul.f32 1.442695, %v1707_v34  ;;  %v1850_v44 = vsub.s32 %v3159_v59, %v2704_v41  ;;  %v3210_v34 = vadd.s32 4294967240, %v3150_v51 }
 0x547   :  { %v1708_v23 = vsub.f32 0.0, %v1692_v20  ;;  %2349 = vpow2.f32 %v1733_v50  ;;  %v1762_v50 = vsel %vm1746_vm4, 1.0, %v3138_v24  ;;  %v1763_v24 = vsel %vm1747_vm6, 1.0, %v3144_v27 }
 0x548   :  { %vm1754_vm4 = vcmp.ge.f32.partialorder %v3119_v7, 0.0  ;;  %vm1756_vm6 = vcmp.ge.f32.partialorder %v3127_v14, 0.0 }
 0x549   :  { %v1735_v63 = vmul.f32 1.442695, %v1708_v23 }
 0x54b   :  { %2351 = vpow2.f32 %v1735_v63 }
 0x557   :  { %v1645_v49 = vpop.xlane.xlu1 %1644 }
 0x558   :  { %v3130_v48 = vadd.f32 %v3082_v32, %v1645_v49  ;;  %v3167_v49 = vpop.eup %2335 }
 0x559   :  { %v2338_v60 = vpop.eup %2337 }
 0x55a   :  { %v1693_v22 = vand.u32 2147483647, %v3130_v48 }
 0x55b   :  { %v1648_v11 = vpop.xlane.xlu1 %1647 }
 0x55c   :  { %v3136_v16 = vadd.f32 %v3082_v32, %v1648_v11  ;;  %v1709_v31 = vsub.f32 0.0, %v1693_v22  ;;  %v2340_v11 = vpop.eup %2339 }
 0x55d   :  { %v3186_v40 = vpop.eup %2341  ;;  %v1796_v59 = vmul.f32 %v2340_v11, %v1762_v50  ;;  %v3235_v11 = vadd.s32 4294967232, %v3150_v51 }
 0x55e   :  { %v1694_v30 = vand.u32 2147483647, %v3136_v16  ;;  %v1737_v43 = vmul.f32 1.442695, %v1709_v31  ;;  %v3195_v26 = vpop.eup %2343  ;;  %v1784_v36 = vadd.f32 1.0, %v3186_v40 }
 0x55f   :  { %v2346_v22 = vpop.eup %2345  ;;  %v1785_v31 = vadd.f32 1.0, %v3195_v26  ;;  %v1899_v2 = vsub.s32 %v3235_v11, %v2704_v41 }
 0x560   :  { %v1710_v47 = vsub.f32 0.0, %v1694_v30  ;;  %2353 = vpow2.f32 %v1737_v43  ;;  %v1783_v30 = vadd.f32 1.0, %v3167_v49  ;;  %v3207_v53 = vpop.eup %2347 }
 0x561   :  { %v3214_v37 = vpop.eup %2349  ;;  %v1786_v0 = vadd.f32 1.0, %v3207_v53 }
 0x562   :  { %v1739_v52 = vmul.f32 1.442695, %v1710_v47  ;;  %v3219_v42 = vpop.eup %2351  ;;  %v1761_v47 = vsel %vm1745_vm3, 1.0, %v3132_v15  ;;  %vm1908_vm3 = vcmask 654912  }
 0x564   :  { %2355 = vpow2.f32 %v1739_v52  ;;  %v1794_v52 = vmul.f32 %v2338_v60, %v1761_v47  ;;  %v1788_v60 = vadd.f32 1.0, %v3219_v42  ;;  %v1765_v47 = vsel %vm1749_vm10, 1.0, %v3154_v39 }
 0x565   :  { %2357 = vrcp.f32 %v1780_v54  ;;  %v1892_v54 = vsub.s32 %v3210_v34, %v2704_v41  ;;  %vm1915_vm10 = vcmask 720512  }
 0x566   :  { %2359 = vrcp.f32 %v1781_v8  ;;  %v1798_v8 = vmul.f32 %v2346_v22, %v1763_v24  ;;  %v1846_v45 = vrot.slane %v1794_v52, %v1845_v12  ;;  %v3246_v22 = vadd.s32 4294967208, %v3150_v51 }
 0x567   :  { %2361 = vrcp.f32 %v1782_v25  ;;  %v1851_v25 = vrot.slane %v1796_v59, %v1850_v44  ;;  %v3250_v12 = vadd.s32 4294967200, %v3150_v51  ;;  %v3253_v44 = vadd.s32 4294967192, %v3150_v51 }
 0x568   :  { %v1920_v59 = vsub.s32 %v3246_v22, %v2704_v41 }
 0x569   :  { %v1853_v50 = vsel %vm1852_vm2, %v1851_v25, %v1846_v45  ;;  %v1927_v24 = vsub.s32 %v3250_v12, %v2704_v41  ;;  %v1768_v25 = vsel %vm1752_vm0, 1.0, %v3186_v40  ;;  %vm1753_vm2 = vcmp.ge.f32.partialorder %v3116_v1, 0.0 }
 0x56a   :  { %v3223_v43 = vpop.eup %2353  ;;  %v1769_v40 = vsel %vm1753_vm2, 1.0, %v3195_v26  ;;  %vm1950_vm0 = vcmask 1048512  }
 0x56e   :  { %v3226_v3 = vpop.eup %2355 }
 0x56f   :  { %v2358_v27 = vpop.eup %2357 }
 0x572   :  { %v1651_v17 = vpop.xlane.xlu1 %1650 }
 0x573   :  { %v3174_v4 = vadd.f32 %v3082_v32, %v1651_v17  ;;  %v1787_v17 = vadd.f32 1.0, %v3214_v37 }
 0x575   :  { %v1695_v13 = vand.u32 2147483647, %v3174_v4 }
 0x576   :  { %v1654_v19 = vpop.xlane.xlu1 %1653 }
 0x577   :  { %v1711_v20 = vsub.f32 0.0, %v1695_v13  ;;  %v3200_v21 = vadd.f32 %v3082_v32, %v1654_v19  ;;  %v1789_v13 = vadd.f32 1.0, %v3223_v43  ;;  %v1790_v19 = vadd.f32 1.0, %v3226_v3 }
 0x579   :  { %v1741_v32 = vmul.f32 1.442695, %v1711_v20  ;;  %v1696_v23 = vand.u32 2147483647, %v3200_v21  ;;  %v3240_v20 = vadd.s32 4294967224, %v3150_v51 }
 0x57b   :  { %2363 = vpow2.f32 %v1741_v32  ;;  %v1712_v63 = vsub.f32 0.0, %v1696_v23  ;;  %v1764_v32 = vsel %vm1748_vm9, 1.0, %v3152_v55  ;;  %v1858_v23 = vrot.slane %v1798_v8, %v1857_v6 }
 0x57c   :  { %2365 = vrcp.f32 %v1783_v30  ;;  %v3243_v30 = vadd.s32 4294967216, %v3150_v51  ;;  %v1800_v56 = vmul.f32 %v2358_v27, %v1764_v32  ;;  %v1906_v55 = vsub.s32 %v3240_v20, %v2704_v41 }
 0x57d   :  { %2367 = vrcp.f32 %v1784_v36  ;;  %v1743_v15 = vmul.f32 1.442695, %v1712_v63  ;;  %v2360_v36 = vpop.eup %2359  ;;  %v1766_v6 = vsel %vm1750_vm11, 1.0, %v3156_v58  ;;  %vm1759_vm9 = vcmp.ge.f32.partialorder %v3174_v4, 0.0 }
 0x57e   :  { %2369 = vrcp.f32 %v1785_v31  ;;  %v2362_v31 = vpop.eup %2361  ;;  %v1802_v52 = vmul.f32 %v2360_v36, %v1765_v47  ;;  %v1913_v39 = vsub.s32 %v3243_v30, %v2704_v41  ;;  %v1865_v8 = vrot.slane %v1800_v56, %v1864_v18 }
 0x57f   :  { %2371 = vpow2.f32 %v1743_v15  ;;  %v1860_v15 = vsel %vm1859_vm5, %v1858_v23, %v1853_v50  ;;  %v1770_v30 = vsel %vm1754_vm4, 1.0, %v3207_v53  ;;  %vm1755_vm5 = vcmp.ge.f32.partialorder %v3123_v9, 0.0 }
 0x580   :  { %2373 = vrcp.f32 %v1786_v0  ;;  %v1872_v45 = vrot.slane %v1802_v52, %v1871_v10  ;;  %v1867_v18 = vsel %vm1866_vm7, %v1865_v8, %v1860_v15  ;;  %v1771_v23 = vsel %vm1755_vm5, 1.0, %v3214_v37 }
 0x581   :  { %2375 = vrcp.f32 %v1787_v17  ;;  %v1804_v17 = vmul.f32 %v2362_v31, %v1766_v6  ;;  %vm1757_vm7 = vcmp.ge.f32.partialorder %v3130_v48, 0.0  ;;  %vm1922_vm11 = vcmask 786112  }
 0x582   :  { %2377 = vrcp.f32 %v1788_v60  ;;  %v1934_v60 = vsub.s32 %v3253_v44, %v2704_v41  ;;  %v1874_v36 = vsel %vm1873_vm8, %v1872_v45, %v1867_v18  ;;  %v1773_v31 = vsel %vm1757_vm7, 1.0, %v3223_v43 }
 0x583   :  { %2379 = vrcp.f32 %v1789_v13  ;;  %v1767_v13 = vsel %vm1751_vm14, 1.0, %v3167_v49  ;;  %v1879_v49 = vrot.slane %v1804_v17, %v1878_v28  ;;  %v1772_v28 = vsel %vm1756_vm6, 1.0, %v3219_v42 }
 0x584   :  { %2381 = vrcp.f32 %v1790_v19  ;;  %vm1758_vm8 = vcmp.ge.f32.partialorder %v3136_v16, 0.0  ;;  %v1941_v43 = vsub.s32 %v1938_v62, %v2704_v41  ;;  %vm1936_vm14 = vcmask 917312  }
 0x585   :  { %v3262_v63 = vpop.eup %2363  ;;  %v1774_v47 = vsel %vm1758_vm8, 1.0, %v3226_v3 }
 0x586   :  { %v2366_v46 = vpop.eup %2365  ;;  %v1791_v0 = vadd.f32 1.0, %v3262_v63  ;;  %v1775_v16 = vsel %vm1759_vm9, 1.0, %v3262_v63 }
 0x587   :  { %v2368_v61 = vpop.eup %2367  ;;  %v1806_v38 = vmul.f32 %v2366_v46, %v1767_v13 }
 0x588   :  { %v2370_v58 = vpop.eup %2369  ;;  %2383 = vrcp.f32 %v1791_v0  ;;  %v1808_v35 = vmul.f32 %v2368_v61, %v1768_v25 }
 0x589   :  { %v3285_v11 = vpop.eup %2371  ;;  %v1810_v20 = vmul.f32 %v2370_v58, %v1769_v40  ;;  %v1886_v7 = vrot.slane %v1806_v38, %v1885_v29  ;;  %v1881_v29 = vsel %vm1880_vm12, %v1879_v49, %v1874_v36  ;;  %vm1929_vm12 = vcmask 851712  }
 0x58a   :  { %v2374_v19 = vpop.eup %2373  ;;  %v1792_v57 = vadd.f32 1.0, %v3285_v11  ;;  %v1893_v9 = vrot.slane %v1808_v35, %v1892_v54 }
 0x58b   :  { %v2376_v27 = vpop.eup %2375  ;;  %v1812_v32 = vmul.f32 %v2374_v19, %v1770_v30  ;;  %v1900_v14 = vrot.slane %v1810_v20, %v1899_v2  ;;  %v1888_v34 = vsel %vm1887_vm13, %v1886_v7, %v1881_v29  ;;  %vm1760_vm13 = vcmp.ge.f32.partialorder %v3200_v21, 0.0 }
 0x58c   :  { %v2378_v10 = vpop.eup %2377  ;;  %2385 = vrcp.f32 %v1792_v57  ;;  %v1814_v26 = vmul.f32 %v2376_v27, %v1771_v23  ;;  %v1895_v50 = vsel %vm1894_vm15, %v1893_v9, %v1888_v34  ;;  %vm1943_vm15 = vcmask 982912  }
 0x58d   :  { %v2380_v1 = vpop.eup %2379  ;;  %v1816_v53 = vmul.f32 %v2378_v10, %v1772_v28  ;;  %v1907_v42 = vrot.slane %v1812_v32, %v1906_v55  ;;  %v1902_v52 = vsel %vm1901_vm1, %v1900_v14, %v1895_v50  ;;  %v1948_v55 = vsub.s32 %v1945_v33, %v2704_v41 }
 0x58e   :  { %v2382_v5 = vpop.eup %2381  ;;  %v1818_v37 = vmul.f32 %v2380_v1, %v1773_v31  ;;  %v1914_v54 = vrot.slane %v1814_v26, %v1913_v39  ;;  %v1776_v39 = vsel %vm1760_vm13, 1.0, %v3285_v11 }
 0x58f   :  { %v1820_v56 = vmul.f32 %v2382_v5, %v1774_v47  ;;  %v1921_v51 = vrot.slane %v1816_v53, %v1920_v59  ;;  %v1909_v2 = vsel %vm1908_vm3, %v1907_v42, %v1902_v52 }
 0x590   :  { %v1928_v4 = vrot.slane %v1818_v37, %v1927_v24  ;;  %v1916_v46 = vsel %vm1915_vm10, %v1914_v54, %v1909_v2 }
 0x591   :  { %v1935_v63 = vrot.slane %v1820_v56, %v1934_v60  ;;  %v1923_v59 = vsel %vm1922_vm11, %v1921_v51, %v1916_v46 }
 0x592   :  { %v2384_v48 = vpop.eup %2383  ;;  %v1930_v0 = vsel %vm1929_vm12, %v1928_v4, %v1923_v59 }
 0x593   :  { %v1822_v3 = vmul.f32 %v2384_v48, %v1775_v16  ;;  %v1937_v44 = vsel %vm1936_vm14, %v1935_v63, %v1930_v0 }
 0x595   :  { %v1942_v6 = vrot.slane %v1822_v3, %v1941_v43 }
 0x596   :  { %v2386_v22 = vpop.eup %2385 }
 0x597   :  { %v1824_v12 = vmul.f32 %v2386_v22, %v1776_v39  ;;  %v1944_v17 = vsel %vm1943_vm15, %v1942_v6, %v1937_v44 }
 0x599   :  { %v1949_v61 = vrot.slane %v1824_v12, %v1948_v55 }
 0x59b   :  { %v1951_v41 = vsel %vm1950_vm0, %v1949_v61, %v1944_v17 }
 0x59c   :  { %1953 = vst [vmem:[#allocation8] sm:$0x1] %v1951_v41 }
 0x59d   :  { %2442 = shalt.err (!%p2439_p6)
}
 0x59e   :  { %s2443_s12 = scalar_lea.hbm %s3363_s13, 16 }
 0x59f   :  { %p2444_p7 = scmp.ne.s32.totalorder %s3363_s13, %s2443_s12  ;;  %p2447_p8 = scmp.lt.u32.totalorder %s2443_s12, %s3363_s13 }
 0x5a1   :  { %p2449_p9 = pnand %p2447_p8, %p2444_p7 }
 0x5a3   :  { %2452 = shalt.err (!%p2449_p9)
}
 0x5a4   :  { %1963 = dma.vmem_to_hbm [thread:$0]  %s1961_s11, 16, %s3363_s13, [#allocation5]  }
 0x5a5   :  { %2457 = dma.done.wait [#allocation5], 16  }
 0x5a6   :  { %2458 = vsyncadd [#allocation5], 4294967280 }
 0x5a7   :  { %1967 = vsyncpa [#allocation4], 1 }
 0x5a8   :  { %1968 = vsyncpa [#allocation7], 1 }
 0x5a9   :  { %1969 = vsyncpa [#allocation5], 1 }

</bundles_post_ra>
